<compile_context>
chip_gen: v5e
topology: v5e:2x2
jax: 0.10.0
libtpu: 0.0.40
codegen_flags: <defaults>
</compile_context>

<pallas_src>
import functools

import jax
import jax.numpy as jnp
from jax.experimental import pallas as pl
from jax.experimental.pallas import tpu as pltpu


# --------------------------------------------------------------------------
# Fused kernel: one grid step == one graph.
# --------------------------------------------------------------------------
def _mask_gat_kernel(h_ref, bias_ref, const_ref, vec_ref, w_ref, wlin_ref,
                     out_ref, *, num_gat_layers, num_heads, num_nodes,
                     head_dim, out_dim, neg_slope):
    H, N, Dh = num_heads, num_nodes, head_dim
    D = H * Dh
    HN = H * N

    # Constant structure matrices (loaded once per graph, shared by all layers).
    ger = const_ref[0:D, :]                                   # (D, HN)  head block one-hot
    sel = const_ref[D:D + N, :]                               # (N, HN)  [src == col%N]
    fhm = const_ref[D + N:D + N + HN, 0:D]                    # (HN, D)  row-head mask
    frep = const_ref[D + N + HN:D + N + 2 * HN, 0:N]          # (HN, N)  row-repeat matrix
    bias = bias_ref[0]                                        # (N, HN)  additive mask 0/-1e30
    ones_nn = jnp.ones((N, N), jnp.float32)

    hidden = h_ref[0]                                         # (N, Dk) stays in VMEM/vregs

    for layer in range(num_gat_layers):                       # static unroll over layers
        r = 4 * layer
        al = vec_ref[r + 0:r + 1, :]                          # (1, D) attn_l (head-major)
        ar = vec_ref[r + 1:r + 2, :]                          # (1, D) attn_r
        scale = vec_ref[r + 2:r + 3, :]                       # (1, D) folded BN scale
        shift = vec_ref[r + 3:r + 4, :]                       # (1, D) folded BN shift (+GAT bias)

        w_full = w_ref[layer]                                 # (Dk, D)
        wl = w_full if layer == 0 else w_full[0:D, :]
        feat = jnp.dot(hidden, wl, preferred_element_type=jnp.float32)          # (N, D)

        # --- all-head scores in one lane-dense (N, H*N) tile -----------------
        # er_full[dst, hd*N+src] = er[dst, hd]
        er_full = jnp.dot(feat * ar, ger, preferred_element_type=jnp.float32)   # (N, HN)
        # el_blk[src, hd*N+j]   = el[src, hd]; select diagonal then broadcast rows
        el_blk = jnp.dot(feat * al, ger, preferred_element_type=jnp.float32)    # (N, HN)
        el_full = jnp.dot(ones_nn, el_blk * sel,
                          preferred_element_type=jnp.float32)                   # (N, HN)

        e = er_full + el_full
        e = jnp.where(e >= 0.0, e, neg_slope * e)             # LeakyReLU(0.2), once for all heads
        e = e + bias                                          # additive adjacency mask
        # Row max clamped at 0: overflow guard + zero-in-degree rows -> p == 0.
        m = jnp.maximum(jnp.max(e, axis=1, keepdims=True), 0.0)
        p = jnp.exp(e - m)                                    # masked cols underflow to exactly 0

        # per-(dst, head) denominators, broadcast onto each head's Dh lanes
        denom = jnp.dot(p, fhm, preferred_element_type=jnp.float32)             # (N, D)
        # block-diagonal features: f_bd[hd*N+src, d] = feat[src, d] * [head(d)==hd]
        f_bd = jnp.dot(frep, feat, preferred_element_type=jnp.float32) * fhm    # (HN, D)
        agg = jnp.dot(p, f_bd, preferred_element_type=jnp.float32)              # (N, D)

        denom = jnp.where(denom > 0.0, denom, 1.0)            # exact zero-in-degree guard
        # approx reciprocal -> attention rows sum to 1 only to ~1e-4 (inference OK)
        rst = agg * pl.reciprocal(denom, approx=True)

        # GATConv bias + BatchNorm1d(eval, eps=1e-3) folded into one affine.
        y = jnp.maximum(rst * scale + shift, 0.0)             # ReLU
        if layer != 0:                                        # residual (i != 0)
            y = y + hidden
        hidden = y

    # SumPooling on the MXU + MaskLinear head (mask pre-applied to weight).
    pooled = jnp.dot(jnp.ones((1, N), jnp.float32), hidden,
                     preferred_element_type=jnp.float32)                        # (1, D)
    out = jnp.dot(pooled, wlin_ref[...], preferred_element_type=jnp.float32)
    out = out + vec_ref[4 * num_gat_layers:4 * num_gat_layers + 1, 0:out_dim]
    out_ref[0] = out
    # TODO(synk): final_dropout is identity at inference (training=False path).


# --------------------------------------------------------------------------
# pallas_call wrapper (graph batch = "parallel" grid axis).
# --------------------------------------------------------------------------
def _mask_gat_fused(h_pad, bias, const_slab, vec_slab, w_stack, w_eff, *,
                    num_heads, head_dim, out_dim, neg_slope):
    G, N, Dk = h_pad.shape
    L = w_stack.shape[0]
    HN = num_heads * N

    kernel = functools.partial(
        _mask_gat_kernel, num_gat_layers=L, num_heads=num_heads,
        num_nodes=N, head_dim=head_dim, out_dim=out_dim, neg_slope=neg_slope)

    return pl.pallas_call(
        kernel,
        out_shape=jax.ShapeDtypeStruct((G, 1, out_dim), jnp.float32),
        grid=(G,),
        in_specs=[
            pl.BlockSpec((1, N, Dk), lambda g: (g, 0, 0)),          # per-graph node feats
            pl.BlockSpec((1, N, HN), lambda g: (g, 0, 0)),          # per-graph additive mask
            pl.BlockSpec(const_slab.shape, lambda g: (0, 0)),       # shared structure slab
            pl.BlockSpec(vec_slab.shape, lambda g: (0, 0)),         # shared vector slab
            pl.BlockSpec(w_stack.shape, lambda g: (0, 0, 0)),       # shared stacked weights
            pl.BlockSpec(w_eff.shape, lambda g: (0, 0)),            # shared masked head weight
        ],
        out_specs=pl.BlockSpec((1, 1, out_dim), lambda g: (g, 0, 0)),
        compiler_params=pltpu.CompilerParams(
            dimension_semantics=("parallel",)),                     # both TCs on v7x
        # VMEM footprint is far below the 32 MiB scoped default on every
        # generation (v7x has 64 MiB physical); no vmem_limit override needed.
    )(h_pad, bias, const_slab, vec_slab, w_stack, w_eff)


# --------------------------------------------------------------------------
# One-time parameter packing (hoisted out of the per-call hot path).
# --------------------------------------------------------------------------
def pack_mask_gat_params(layer_params, bn_params, lin_params, *, num_heads,
                         head_dim, input_dim, num_nodes, threshold,
                         bn_eps=1e-3):
    H, Dh, N = num_heads, head_dim, num_nodes
    D = H * Dh
    HN = H * N
    assert HN >= D and HN >= N, "constant slab layout assumes H*N >= H*Dh and >= N"
    Dk = max(input_dim, D)
    w_lin, mask_real, b_lin = lin_params
    out_dim = w_lin.shape[0]

    # --- vector slab: [al, ar, bn_scale, bn_shift] per layer + padded b_lin ---
    rows, w_list = [], []
    for (w, al, ar, b), (gamma, beta, mean, var) in zip(layer_params, bn_params):
        scale = gamma / jnp.sqrt(var + bn_eps)                  # BN folded to affine
        shift = (b - mean) * scale + beta                       # GATConv bias folded in
        rows += [al.reshape(1, D), ar.reshape(1, D),            # head-major == feat layout
                 scale.reshape(1, D), shift.reshape(1, D)]
        w_list.append(jnp.zeros((Dk, D), jnp.float32).at[:w.shape[0], :].set(w))
    rows.append(jnp.zeros((1, D), jnp.float32).at[:, :out_dim].set(b_lin.reshape(1, out_dim)))
    vec_slab = jnp.concatenate(rows, axis=0)                    # (4L+1, D)
    w_stack = jnp.stack(w_list, axis=0)                         # (L, Dk, D)

    # --- constant structure slab (GER ; selector ; head-mask ; row-repeat) ---
    head_of_lane = jnp.arange(D, dtype=jnp.int32) // Dh         # (D,)
    head_of_col = jnp.arange(HN, dtype=jnp.int32) // N          # (HN,)
    src_of_col = jnp.arange(HN, dtype=jnp.int32) % N            # (HN,)
    ger = (head_of_lane[:, None] == head_of_col[None, :]).astype(jnp.float32)   # (D, HN)
    sel = (jnp.arange(N, dtype=jnp.int32)[:, None] == src_of_col[None, :]
           ).astype(jnp.float32)                                                # (N, HN)
    fhm = ger.T                                                                 # (HN, D)
    frep = sel.T                                                                # (HN, N)
    pad_cols = lambda x: jnp.pad(x, ((0, 0), (0, HN - x.shape[1])))
    const_slab = jnp.concatenate([ger, sel, pad_cols(fhm), pad_cols(frep)],
                                 axis=0)                                        # (D+N+2HN, HN)

    # MaskLinear: binarizer uses strict '>' at the threshold boundary.
    w_eff = (w_lin * (mask_real > threshold).astype(jnp.float32)).T             # (D, out)

    return dict(vec_slab=vec_slab, w_stack=w_stack,
                const_slab=const_slab, w_eff=w_eff)


def mask_gat_forward(adj, h, packed, *, num_heads, head_dim, input_dim,
                     out_dim, neg_slope=0.2):
    """adj: (G, N, N) with adj[g, dst, src]>0 iff edge src->dst; h: (G, N, Din)."""
    G, N, _ = h.shape
    D = num_heads * head_dim
    Dk = max(input_dim, D)
    h_pad = jnp.zeros((G, N, Dk), jnp.float32).at[:, :, :input_dim].set(h)
    # additive attention mask, tiled once per head block
    bias = jnp.tile(jnp.where(adj > 0.0, 0.0, -1e30).astype(jnp.float32),
                    (1, 1, num_heads))                                           # (G, N, H*N)
    return _mask_gat_fused(h_pad, bias, packed["const_slab"], packed["vec_slab"],
                           packed["w_stack"], packed["w_eff"],
                           num_heads=num_heads, head_dim=head_dim,
                           out_dim=out_dim, neg_slope=neg_slope)


# --------------------------------------------------------------------------
# Pure-JAX reference (same inference semantics) for a single graph.
# --------------------------------------------------------------------------
def _mask_gat_reference(adj, h, layer_params, bn_params, lin_params, *,
                        num_heads, head_dim, threshold, bn_eps=1e-3,
                        neg_slope=0.2):
    H, Dh = num_heads, head_dim
    D = H * Dh
    hidden = h
    for li, ((w, al, ar, b), (gamma, beta, mean, var)) in enumerate(
            zip(layer_params, bn_params)):
        feat = hidden @ w                                       # (N, D)
        fh = feat.reshape(-1, H, Dh)
        el = (fh * al[None]).sum(-1)                            # (N, H)
        er = (fh * ar[None]).sum(-1)                            # (N, H)
        e = er[:, None, :] + el[None, :, :]                     # (dst, src, H)
        e = jnp.where(e >= 0.0, e, neg_slope * e)
        mask = (adj > 0.0)[:, :, None]
        e = jnp.where(mask, e, -jnp.inf)
        m = jnp.max(e, axis=1, keepdims=True)
        m = jnp.where(jnp.isfinite(m), m, 0.0)
        p = jnp.where(mask, jnp.exp(e - m), 0.0)
        denom = p.sum(axis=1, keepdims=True)
        alpha = p / jnp.where(denom > 0.0, denom, 1.0)
        rst = jnp.einsum('dsh,shk->dhk', alpha, fh).reshape(-1, D) + b
        y = (rst - mean) / jnp.sqrt(var + bn_eps) * gamma + beta
        y = jnp.maximum(y, 0.0)
        if li != 0:
            y = y + hidden
        hidden = y
    pooled = hidden.sum(0, keepdims=True)
    w_lin, mask_real, b_lin = lin_params
    w_eff = w_lin * (mask_real > threshold).astype(jnp.float32)
    return pooled @ w_eff.T + b_lin


# --------------------------------------------------------------------------
# Parameter init helpers (deterministic demo parameters).
# --------------------------------------------------------------------------
def _init_gat_params(key, din, num_heads, head_dim):
    k1, k2, k3, k4 = jax.random.split(key, 4)
    d_out = num_heads * head_dim
    w = 0.1 * jax.random.normal(k1, (din, d_out), jnp.float32)
    al = 0.1 * jax.random.normal(k2, (num_heads, head_dim), jnp.float32)
    ar = 0.1 * jax.random.normal(k3, (num_heads, head_dim), jnp.float32)
    b = 0.1 * jax.random.normal(k4, (1, d_out), jnp.float32)
    return w, al, ar, b


def _init_bn_params(key, d):
    k1, k2, k3, k4 = jax.random.split(key, 4)
    gamma = 1.0 + 0.1 * jax.random.normal(k1, (1, d), jnp.float32)
    beta = 0.1 * jax.random.normal(k2, (1, d), jnp.float32)
    mean = 0.1 * jax.random.normal(k3, (1, d), jnp.float32)
    var = 0.9 + 0.1 * jnp.abs(jax.random.normal(k4, (1, d), jnp.float32))
    return gamma, beta, mean, var


if __name__ == "__main__":
    # MaskGAT(num_layers=3, input_dim=16, hidden_dim=8, output_dim=4,
    #         final_dropout=0.5, graph_pooling_type='sum', num_heads=8)
    num_layers = 3
    input_dim = 16
    hidden_dim = 8
    num_heads = 8
    output_dim = 4
    threshold = 0.5
    G, N = 4, 16                              # batch of 4 graphs, 16 nodes each
    D = hidden_dim * num_heads                # 64
    L = num_layers - 1                        # 2 GAT layers

    key = jax.random.PRNGKey(0)
    keys = jax.random.split(key, 5 + 2 * L)
    kh, kadj, klin, kmask, kblin = keys[:5]
    klayers = keys[5:]

    h = jax.random.normal(kh, (G, N, input_dim), jnp.float32)
    adj = (jax.random.uniform(kadj, (G, N, N)) < 0.35).astype(jnp.float32)  # adj[g,dst,src]

    layer_params, bn_params = [], []
    for i in range(L):
        din = input_dim if i == 0 else D
        layer_params.append(_init_gat_params(klayers[2 * i], din, num_heads, hidden_dim))
        bn_params.append(_init_bn_params(klayers[2 * i + 1], D))

    w_lin = 0.1 * jax.random.normal(klin, (output_dim, D), jnp.float32)
    mask_real = jax.random.uniform(kmask, (output_dim, D), jnp.float32)
    b_lin = 0.1 * jax.random.normal(kblin, (1, output_dim), jnp.float32)
    lin_params = (w_lin, mask_real, b_lin)

    # One-time packing (model-load time).
    packed = pack_mask_gat_params(layer_params, bn_params, lin_params,
                                  num_heads=num_heads, head_dim=hidden_dim,
                                  input_dim=input_dim, num_nodes=N,
                                  threshold=threshold)

    apply_fn = jax.jit(functools.partial(mask_gat_forward, num_heads=num_heads,
                                         head_dim=hidden_dim, input_dim=input_dim,
                                         out_dim=output_dim))
    out = jax.block_until_ready(apply_fn(adj, h, packed))
    out = out.reshape(G, output_dim)

    # Reference check (loose tolerance: approx-reciprocal softmax ~1e-4 rel).
    ref = jnp.stack([_mask_gat_reference(adj[g], h[g], layer_params, bn_params,
                                         lin_params, num_heads=num_heads,
                                         head_dim=hidden_dim, threshold=threshold)[0]
                     for g in range(G)], axis=0)

    assert out.shape == (G, output_dim)
    assert bool(jnp.all(jnp.isfinite(out)))
    assert bool(jnp.allclose(out, ref, rtol=1e-2, atol=1e-3)), (out, ref)
    print("KERNEL_OK")
</pallas_src>

<mosaic_0001>
module attributes {stable_mosaic.version = 11 : i64} {
  func.func @_mask_gat_kernel(%arg0: i32, %arg1: memref<1x16x64xf32, #tpu.memory_space<vmem>>, %arg2: memref<1x16x128xf32, #tpu.memory_space<vmem>>, %arg3: memref<336x128xf32, #tpu.memory_space<vmem>>, %arg4: memref<9x64xf32, #tpu.memory_space<vmem>>, %arg5: memref<2x64x64xf32, #tpu.memory_space<vmem>>, %arg6: memref<64x4xf32, #tpu.memory_space<vmem>>, %arg7: memref<1x1x4xf32, #tpu.memory_space<vmem>>) attributes {dimension_semantics = [#tpu.dimension_semantics<parallel>], iteration_bounds = array<i64: 4>, scalar_prefetch = 0 : i64, scratch_operands = 0 : i64, tpu.core_type = #tpu.core_type<tc>, window_params = [{transform_indices = @transform_0, window_bounds = array<i64: 1, 16, 64>}, {transform_indices = @transform_1, window_bounds = array<i64: 1, 16, 128>}, {pipeline_mode = #tpu.pipeline_mode<synchronous>, transform_indices = @transform_2, window_bounds = array<i64: 336, 128>}, {pipeline_mode = #tpu.pipeline_mode<synchronous>, transform_indices = @transform_3, window_bounds = array<i64: 9, 64>}, {pipeline_mode = #tpu.pipeline_mode<synchronous>, transform_indices = @transform_4, window_bounds = array<i64: 2, 64, 64>}, {pipeline_mode = #tpu.pipeline_mode<synchronous>, transform_indices = @transform_5, window_bounds = array<i64: 64, 4>}, {transform_indices = @transform_6, window_bounds = array<i64: 1, 1, 4>}]} {
    %c0 = arith.constant 0 : index
    %c0_0 = arith.constant 0 : index
    %0 = vector.load %arg3[%c0, %c0_0] : memref<336x128xf32, #tpu.memory_space<vmem>>, vector<64x128xf32>
    %c64 = arith.constant 64 : index
    %c0_1 = arith.constant 0 : index
    %1 = vector.load %arg3[%c64, %c0_1] : memref<336x128xf32, #tpu.memory_space<vmem>>, vector<16x128xf32>
    %c80 = arith.constant 80 : index
    %c0_2 = arith.constant 0 : index
    %2 = vector.load %arg3[%c80, %c0_2] : memref<336x128xf32, #tpu.memory_space<vmem>>, vector<128x64xf32>
    %c208 = arith.constant 208 : index
    %c0_3 = arith.constant 0 : index
    %3 = vector.load %arg3[%c208, %c0_3] : memref<336x128xf32, #tpu.memory_space<vmem>>, vector<128x16xf32>
    %c0_4 = arith.constant 0 : index
    %c0_5 = arith.constant 0 : index
    %c0_6 = arith.constant 0 : index
    %4 = vector.load %arg2[%c0_4, %c0_5, %c0_6] : memref<1x16x128xf32, #tpu.memory_space<vmem>>, vector<1x16x128xf32>
    %5 = vector.shape_cast %4 : vector<1x16x128xf32> to vector<16x128xf32>
    %cst = arith.constant 1.000000e+00 : f32
    %6 = vector.broadcast %cst : f32 to vector<16x16xf32>
    %c0_7 = arith.constant 0 : index
    %c0_8 = arith.constant 0 : index
    %c0_9 = arith.constant 0 : index
    %7 = vector.load %arg1[%c0_7, %c0_8, %c0_9] : memref<1x16x64xf32, #tpu.memory_space<vmem>>, vector<1x16x64xf32>
    %8 = vector.shape_cast %7 : vector<1x16x64xf32> to vector<16x64xf32>
    %c0_10 = arith.constant 0 : index
    %c0_11 = arith.constant 0 : index
    %9 = vector.load %arg4[%c0_10, %c0_11] : memref<9x64xf32, #tpu.memory_space<vmem>>, vector<1x64xf32>
    %c1 = arith.constant 1 : index
    %c0_12 = arith.constant 0 : index
    %10 = vector.load %arg4[%c1, %c0_12] : memref<9x64xf32, #tpu.memory_space<vmem>>, vector<1x64xf32>
    %c2 = arith.constant 2 : index
    %c0_13 = arith.constant 0 : index
    %11 = vector.load %arg4[%c2, %c0_13] : memref<9x64xf32, #tpu.memory_space<vmem>>, vector<1x64xf32>
    %c3 = arith.constant 3 : index
    %c0_14 = arith.constant 0 : index
    %12 = vector.load %arg4[%c3, %c0_14] : memref<9x64xf32, #tpu.memory_space<vmem>>, vector<1x64xf32>
    %c0_15 = arith.constant 0 : index
    %c0_16 = arith.constant 0 : index
    %c0_17 = arith.constant 0 : index
    %13 = vector.load %arg5[%c0_15, %c0_16, %c0_17] : memref<2x64x64xf32, #tpu.memory_space<vmem>>, vector<1x64x64xf32>
    %14 = vector.shape_cast %13 : vector<1x64x64xf32> to vector<64x64xf32>
    %cst_18 = arith.constant dense<0.000000e+00> : vector<16x64xf32>
    %15 = tpu.matmul %8, %14, %cst_18 {dimension_numbers = #tpu.dot_dimension_numbers<[1], [0], [0], [1], [0, 0, 1, 1], [], []>} : vector<16x64xf32>, vector<64x64xf32>, vector<16x64xf32> -> vector<16x64xf32>
    %16 = vector.broadcast %10 : vector<1x64xf32> to vector<16x64xf32>
    %17 = arith.mulf %15, %16 : vector<16x64xf32>
    %cst_19 = arith.constant dense<0.000000e+00> : vector<16x128xf32>
    %18 = tpu.matmul %17, %0, %cst_19 {dimension_numbers = #tpu.dot_dimension_numbers<[1], [0], [0], [1], [0, 0, 1, 1], [], []>} : vector<16x64xf32>, vector<64x128xf32>, vector<16x128xf32> -> vector<16x128xf32>
    %19 = vector.broadcast %9 : vector<1x64xf32> to vector<16x64xf32>
    %20 = arith.mulf %15, %19 : vector<16x64xf32>
    %cst_20 = arith.constant dense<0.000000e+00> : vector<16x128xf32>
    %21 = tpu.matmul %20, %0, %cst_20 {dimension_numbers = #tpu.dot_dimension_numbers<[1], [0], [0], [1], [0, 0, 1, 1], [], []>} : vector<16x64xf32>, vector<64x128xf32>, vector<16x128xf32> -> vector<16x128xf32>
    %22 = arith.mulf %21, %1 : vector<16x128xf32>
    %cst_21 = arith.constant dense<0.000000e+00> : vector<16x128xf32>
    %23 = tpu.matmul %6, %22, %cst_21 {dimension_numbers = #tpu.dot_dimension_numbers<[1], [0], [0], [1], [0, 0, 1, 1], [], []>} : vector<16x16xf32>, vector<16x128xf32>, vector<16x128xf32> -> vector<16x128xf32>
    %24 = arith.addf %18, %23 : vector<16x128xf32>
    %cst_22 = arith.constant 0.000000e+00 : f32
    %25 = vector.broadcast %cst_22 : f32 to vector<16x128xf32>
    %26 = arith.cmpf oge, %24, %25 : vector<16x128xf32>
    %cst_23 = arith.constant 2.000000e-01 : f32
    %27 = vector.broadcast %cst_23 : f32 to vector<16x128xf32>
    %28 = arith.mulf %27, %24 : vector<16x128xf32>
    %29 = arith.select %26, %24, %28 : vector<16x128xi1>, vector<16x128xf32>
    %30 = arith.addf %29, %5 : vector<16x128xf32>
    %cst_24 = arith.constant dense<0xFF800000> : vector<16xf32>
    %31 = vector.multi_reduction <maximumf>, %30, %cst_24 [1] : vector<16x128xf32> to vector<16xf32>
    %32 = vector.shape_cast %31 : vector<16xf32> to vector<16x1xf32>
    %cst_25 = arith.constant 0.000000e+00 : f32
    %33 = vector.broadcast %cst_25 : f32 to vector<16x1xf32>
    %34 = arith.maximumf %32, %33 : vector<16x1xf32>
    %35 = vector.broadcast %34 : vector<16x1xf32> to vector<16x128xf32>
    %36 = arith.subf %30, %35 : vector<16x128xf32>
    %37 = math.exp %36 : vector<16x128xf32>
    %cst_26 = arith.constant dense<0.000000e+00> : vector<16x64xf32>
    %38 = tpu.matmul %37, %2, %cst_26 {dimension_numbers = #tpu.dot_dimension_numbers<[1], [0], [0], [1], [0, 0, 1, 1], [], []>} : vector<16x128xf32>, vector<128x64xf32>, vector<16x64xf32> -> vector<16x64xf32>
    %cst_27 = arith.constant dense<0.000000e+00> : vector<128x64xf32>
    %39 = tpu.matmul %3, %15, %cst_27 {dimension_numbers = #tpu.dot_dimension_numbers<[1], [0], [0], [1], [0, 0, 1, 1], [], []>} : vector<128x16xf32>, vector<16x64xf32>, vector<128x64xf32> -> vector<128x64xf32>
    %40 = arith.mulf %39, %2 : vector<128x64xf32>
    %cst_28 = arith.constant dense<0.000000e+00> : vector<16x64xf32>
    %41 = tpu.matmul %37, %40, %cst_28 {dimension_numbers = #tpu.dot_dimension_numbers<[1], [0], [0], [1], [0, 0, 1, 1], [], []>} : vector<16x128xf32>, vector<128x64xf32>, vector<16x64xf32> -> vector<16x64xf32>
    %cst_29 = arith.constant 0.000000e+00 : f32
    %42 = vector.broadcast %cst_29 : f32 to vector<16x64xf32>
    %43 = arith.cmpf ogt, %38, %42 : vector<16x64xf32>
    %cst_30 = arith.constant 1.000000e+00 : f32
    %44 = vector.broadcast %cst_30 : f32 to vector<16x64xf32>
    %45 = arith.select %43, %38, %44 : vector<16x64xi1>, vector<16x64xf32>
    %46 = tpu.reciprocal %45 {approx = true} : vector<16x64xf32> -> vector<16x64xf32>
    %47 = arith.mulf %41, %46 : vector<16x64xf32>
    %48 = vector.broadcast %11 : vector<1x64xf32> to vector<16x64xf32>
    %49 = arith.mulf %47, %48 : vector<16x64xf32>
    %50 = vector.broadcast %12 : vector<1x64xf32> to vector<16x64xf32>
    %51 = arith.addf %49, %50 : vector<16x64xf32>
    %cst_31 = arith.constant 0.000000e+00 : f32
    %52 = vector.broadcast %cst_31 : f32 to vector<16x64xf32>
    %53 = arith.maximumf %51, %52 : vector<16x64xf32>
    %c4 = arith.constant 4 : index
    %c0_32 = arith.constant 0 : index
    %54 = vector.load %arg4[%c4, %c0_32] : memref<9x64xf32, #tpu.memory_space<vmem>>, vector<1x64xf32>
    %c5 = arith.constant 5 : index
    %c0_33 = arith.constant 0 : index
    %55 = vector.load %arg4[%c5, %c0_33] : memref<9x64xf32, #tpu.memory_space<vmem>>, vector<1x64xf32>
    %c6 = arith.constant 6 : index
    %c0_34 = arith.constant 0 : index
    %56 = vector.load %arg4[%c6, %c0_34] : memref<9x64xf32, #tpu.memory_space<vmem>>, vector<1x64xf32>
    %c7 = arith.constant 7 : index
    %c0_35 = arith.constant 0 : index
    %57 = vector.load %arg4[%c7, %c0_35] : memref<9x64xf32, #tpu.memory_space<vmem>>, vector<1x64xf32>
    %c1_36 = arith.constant 1 : index
    %c0_37 = arith.constant 0 : index
    %c0_38 = arith.constant 0 : index
    %58 = vector.load %arg5[%c1_36, %c0_37, %c0_38] : memref<2x64x64xf32, #tpu.memory_space<vmem>>, vector<1x64x64xf32>
    %59 = vector.shape_cast %58 : vector<1x64x64xf32> to vector<64x64xf32>
    %cst_39 = arith.constant dense<0.000000e+00> : vector<16x64xf32>
    %60 = tpu.matmul %53, %59, %cst_39 {dimension_numbers = #tpu.dot_dimension_numbers<[1], [0], [0], [1], [0, 0, 1, 1], [], []>} : vector<16x64xf32>, vector<64x64xf32>, vector<16x64xf32> -> vector<16x64xf32>
    %61 = vector.broadcast %55 : vector<1x64xf32> to vector<16x64xf32>
    %62 = arith.mulf %60, %61 : vector<16x64xf32>
    %cst_40 = arith.constant dense<0.000000e+00> : vector<16x128xf32>
    %63 = tpu.matmul %62, %0, %cst_40 {dimension_numbers = #tpu.dot_dimension_numbers<[1], [0], [0], [1], [0, 0, 1, 1], [], []>} : vector<16x64xf32>, vector<64x128xf32>, vector<16x128xf32> -> vector<16x128xf32>
    %64 = vector.broadcast %54 : vector<1x64xf32> to vector<16x64xf32>
    %65 = arith.mulf %60, %64 : vector<16x64xf32>
    %cst_41 = arith.constant dense<0.000000e+00> : vector<16x128xf32>
    %66 = tpu.matmul %65, %0, %cst_41 {dimension_numbers = #tpu.dot_dimension_numbers<[1], [0], [0], [1], [0, 0, 1, 1], [], []>} : vector<16x64xf32>, vector<64x128xf32>, vector<16x128xf32> -> vector<16x128xf32>
    %67 = arith.mulf %66, %1 : vector<16x128xf32>
    %cst_42 = arith.constant dense<0.000000e+00> : vector<16x128xf32>
    %68 = tpu.matmul %6, %67, %cst_42 {dimension_numbers = #tpu.dot_dimension_numbers<[1], [0], [0], [1], [0, 0, 1, 1], [], []>} : vector<16x16xf32>, vector<16x128xf32>, vector<16x128xf32> -> vector<16x128xf32>
    %69 = arith.addf %63, %68 : vector<16x128xf32>
    %cst_43 = arith.constant 0.000000e+00 : f32
    %70 = vector.broadcast %cst_43 : f32 to vector<16x128xf32>
    %71 = arith.cmpf oge, %69, %70 : vector<16x128xf32>
    %cst_44 = arith.constant 2.000000e-01 : f32
    %72 = vector.broadcast %cst_44 : f32 to vector<16x128xf32>
    %73 = arith.mulf %72, %69 : vector<16x128xf32>
    %74 = arith.select %71, %69, %73 : vector<16x128xi1>, vector<16x128xf32>
    %75 = arith.addf %74, %5 : vector<16x128xf32>
    %cst_45 = arith.constant dense<0xFF800000> : vector<16xf32>
    %76 = vector.multi_reduction <maximumf>, %75, %cst_45 [1] : vector<16x128xf32> to vector<16xf32>
    %77 = vector.shape_cast %76 : vector<16xf32> to vector<16x1xf32>
    %cst_46 = arith.constant 0.000000e+00 : f32
    %78 = vector.broadcast %cst_46 : f32 to vector<16x1xf32>
    %79 = arith.maximumf %77, %78 : vector<16x1xf32>
    %80 = vector.broadcast %79 : vector<16x1xf32> to vector<16x128xf32>
    %81 = arith.subf %75, %80 : vector<16x128xf32>
    %82 = math.exp %81 : vector<16x128xf32>
    %cst_47 = arith.constant dense<0.000000e+00> : vector<16x64xf32>
    %83 = tpu.matmul %82, %2, %cst_47 {dimension_numbers = #tpu.dot_dimension_numbers<[1], [0], [0], [1], [0, 0, 1, 1], [], []>} : vector<16x128xf32>, vector<128x64xf32>, vector<16x64xf32> -> vector<16x64xf32>
    %cst_48 = arith.constant dense<0.000000e+00> : vector<128x64xf32>
    %84 = tpu.matmul %3, %60, %cst_48 {dimension_numbers = #tpu.dot_dimension_numbers<[1], [0], [0], [1], [0, 0, 1, 1], [], []>} : vector<128x16xf32>, vector<16x64xf32>, vector<128x64xf32> -> vector<128x64xf32>
    %85 = arith.mulf %84, %2 : vector<128x64xf32>
    %cst_49 = arith.constant dense<0.000000e+00> : vector<16x64xf32>
    %86 = tpu.matmul %82, %85, %cst_49 {dimension_numbers = #tpu.dot_dimension_numbers<[1], [0], [0], [1], [0, 0, 1, 1], [], []>} : vector<16x128xf32>, vector<128x64xf32>, vector<16x64xf32> -> vector<16x64xf32>
    %cst_50 = arith.constant 0.000000e+00 : f32
    %87 = vector.broadcast %cst_50 : f32 to vector<16x64xf32>
    %88 = arith.cmpf ogt, %83, %87 : vector<16x64xf32>
    %cst_51 = arith.constant 1.000000e+00 : f32
    %89 = vector.broadcast %cst_51 : f32 to vector<16x64xf32>
    %90 = arith.select %88, %83, %89 : vector<16x64xi1>, vector<16x64xf32>
    %91 = tpu.reciprocal %90 {approx = true} : vector<16x64xf32> -> vector<16x64xf32>
    %92 = arith.mulf %86, %91 : vector<16x64xf32>
    %93 = vector.broadcast %56 : vector<1x64xf32> to vector<16x64xf32>
    %94 = arith.mulf %92, %93 : vector<16x64xf32>
    %95 = vector.broadcast %57 : vector<1x64xf32> to vector<16x64xf32>
    %96 = arith.addf %94, %95 : vector<16x64xf32>
    %cst_52 = arith.constant 0.000000e+00 : f32
    %97 = vector.broadcast %cst_52 : f32 to vector<16x64xf32>
    %98 = arith.maximumf %96, %97 : vector<16x64xf32>
    %99 = arith.addf %98, %53 : vector<16x64xf32>
    %cst_53 = arith.constant 1.000000e+00 : f32
    %100 = vector.broadcast %cst_53 : f32 to vector<1x16xf32>
    %cst_54 = arith.constant dense<0.000000e+00> : vector<1x64xf32>
    %101 = tpu.matmul %100, %99, %cst_54 {dimension_numbers = #tpu.dot_dimension_numbers<[1], [0], [0], [1], [0, 0, 1, 1], [], []>} : vector<1x16xf32>, vector<16x64xf32>, vector<1x64xf32> -> vector<1x64xf32>
    %c0_55 = arith.constant 0 : index
    %c0_56 = arith.constant 0 : index
    %102 = vector.load %arg6[%c0_55, %c0_56] : memref<64x4xf32, #tpu.memory_space<vmem>>, vector<64x4xf32>
    %cst_57 = arith.constant dense<0.000000e+00> : vector<1x4xf32>
    %103 = tpu.matmul %101, %102, %cst_57 {dimension_numbers = #tpu.dot_dimension_numbers<[1], [0], [0], [1], [0, 0, 1, 1], [], []>} : vector<1x64xf32>, vector<64x4xf32>, vector<1x4xf32> -> vector<1x4xf32>
    %c8 = arith.constant 8 : index
    %c0_58 = arith.constant 0 : index
    %104 = vector.load %arg4[%c8, %c0_58] : memref<9x64xf32, #tpu.memory_space<vmem>>, vector<1x4xf32>
    %105 = arith.addf %103, %104 : vector<1x4xf32>
    %c0_59 = arith.constant 0 : index
    %c0_60 = arith.constant 0 : index
    %c0_61 = arith.constant 0 : index
    %106 = vector.load %arg7[%c0_59, %c0_60, %c0_61] : memref<1x1x4xf32, #tpu.memory_space<vmem>>, vector<1x1x4xf32>
    %107 = vector.shape_cast %106 : vector<1x1x4xf32> to vector<1x4xf32>
    %108 = vector.shape_cast %105 : vector<1x4xf32> to vector<1x1x4xf32>
    tpu.vector_store %arg7[%c0_59, %c0_60, %c0_61], %108 {strides = array<i32>} : memref<1x1x4xf32, #tpu.memory_space<vmem>>, vector<1x1x4xf32>,
    return
  }
  func.func @transform_0(%arg0: i32) -> (i32, i32, i32) {
    %c0_i32 = arith.constant 0 : i32
    %c0_i32_0 = arith.constant 0 : i32
    %c0_i32_1 = arith.constant 0 : i32
    return %arg0, %c0_i32, %c0_i32_0 : i32, i32, i32
  }
  func.func @transform_1(%arg0: i32) -> (i32, i32, i32) {
    %c0_i32 = arith.constant 0 : i32
    %c0_i32_0 = arith.constant 0 : i32
    %c0_i32_1 = arith.constant 0 : i32
    return %arg0, %c0_i32, %c0_i32_0 : i32, i32, i32
  }
  func.func @transform_2(%arg0: i32) -> (i32, i32) {
    %c0_i32 = arith.constant 0 : i32
    %c0_i32_0 = arith.constant 0 : i32
    %c0_i32_1 = arith.constant 0 : i32
    return %c0_i32, %c0_i32_0 : i32, i32
  }
  func.func @transform_3(%arg0: i32) -> (i32, i32) {
    %c0_i32 = arith.constant 0 : i32
    %c0_i32_0 = arith.constant 0 : i32
    %c0_i32_1 = arith.constant 0 : i32
    return %c0_i32, %c0_i32_0 : i32, i32
  }
  func.func @transform_4(%arg0: i32) -> (i32, i32, i32) {
    %c0_i32 = arith.constant 0 : i32
    %c0_i32_0 = arith.constant 0 : i32
    %c0_i32_1 = arith.constant 0 : i32
    %c0_i32_2 = arith.constant 0 : i32
    return %c0_i32, %c0_i32_0, %c0_i32_1 : i32, i32, i32
  }
  func.func @transform_5(%arg0: i32) -> (i32, i32) {
    %c0_i32 = arith.constant 0 : i32
    %c0_i32_0 = arith.constant 0 : i32
    %c0_i32_1 = arith.constant 0 : i32
    return %c0_i32, %c0_i32_0 : i32, i32
  }
  func.func @transform_6(%arg0: i32) -> (i32, i32, i32) {
    %c0_i32 = arith.constant 0 : i32
    %c0_i32_0 = arith.constant 0 : i32
    %c0_i32_1 = arith.constant 0 : i32
    return %arg0, %c0_i32, %c0_i32_0 : i32, i32, i32
  }
}

</mosaic_0001>

<bundles_post_ra>
// kernel: tile.9
= control target key start
LH: loop header
LB: loop body
LE: loop exit
PB: predicated region body
PF: predicated region fallthrough
CT: control target
= control target key end

     0   :  { %vm4_vm0 = vcmask 1047556   ;;  %s869_s14 = smov 112   ;;  %s870_s22 = smov 96   ;;  %vm6_vm1 = vcmask 130048   ;;  %vm79_vm2 = vcmask 1048448   ;;  %vm166_vm3 = vcmask 917248   ;;  %s1630_s0 = inlined_call_operand.vmem [shape: f32[4,16,8,16], index: 0, kind: input, shape index: {}]   ;;  %s1631_s1 = inlined_call_operand.vmem [shape: f32[4,16,128], index: 1, kind: output, shape index: {}]  }
   0x1   :  { %v706_v0 = vld [vmem:[%s1630_s0 + $0x47] ss:$8 sm:$0xf]   ;;  %v729_v24 = vld [vmem:[%s1630_s0 + $0x46] ss:$8 sm:$0xf]  }
   0x2   :  { %v707_v1 = vld [vmem:[%s1630_s0 + $0x47] ss:$8 sm:$0xf0]   ;;  %v730_v25 = vld [vmem:[%s1630_s0 + $0x46] ss:$8 sm:$0xf0]  }
   0x3   :  { %v97_v2 = vsel %vm4_vm0, %v707_v1, %v706_v0  ;;  %v701_v3 = vld [vmem:[%s1630_s0 + $0x7] ss:$8 sm:$0xf]   ;;  %v724_v26 = vld [vmem:[%s1630_s0 + $0x6] ss:$8 sm:$0xf]   ;;  %v184_v30 = vsel %vm4_vm0, %v730_v25, %v729_v24 }
   0x4   :  { %v702_v4 = vld [vmem:[%s1630_s0 + $0x7] ss:$8 sm:$0xf0]   ;;  %98 = vrot.lane.b32.xlu1 %v97_v2, %s869_s14  ;;  %v725_v27 = vld [vmem:[%s1630_s0 + $0x6] ss:$8 sm:$0xf0]  }
   0x5   :  { %v76_v5 = vsel %vm4_vm0, %v702_v4, %v701_v3  ;;  %v709_v6 = vld [vmem:[%s1630_s0 + $0x147] ss:$8 sm:$0xf]   ;;  %v726_v28 = vld [vmem:[%s1630_s0 + $0x106] ss:$8 sm:$0xf]   ;;  %v163_v31 = vsel %vm4_vm0, %v725_v27, %v724_v26 }
   0x6   :  { %77 = vrot.lane.b32.xlu0 %v76_v5, %s869_s14  ;;  %v710_v7 = vld [vmem:[%s1630_s0 + $0x147] ss:$8 sm:$0xf0]   ;;  %v727_v29 = vld [vmem:[%s1630_s0 + $0x106] ss:$8 sm:$0xf0]  }
   0x7   :  { %v703_v8 = vld [vmem:[%s1630_s0 + $0x107] ss:$8 sm:$0xf]   ;;  %v108_v10 = vsel %vm4_vm0, %v710_v7, %v709_v6  ;;  %v173_v32 = vsel %vm4_vm0, %v727_v29, %v726_v28  ;;  %v738_v33 = vld [vmem:[%s1630_s0 + $0x186] ss:$8 sm:$0xf]  }
   0x8   :  { %v704_v9 = vld [vmem:[%s1630_s0 + $0x107] ss:$8 sm:$0xf0]   ;;  %v739_v34 = vld [vmem:[%s1630_s0 + $0x186] ss:$8 sm:$0xf0]  }
   0x9   :  { %v86_v11 = vsel %vm4_vm0, %v704_v9, %v703_v8  ;;  %v712_v12 = vld [vmem:[%s1630_s0 + $0x87] ss:$8 sm:$0xf]   ;;  %v732_v35 = vld [vmem:[%s1630_s0 + $0x146] ss:$8 sm:$0xf]   ;;  %v217_v39 = vsel %vm4_vm0, %v739_v34, %v738_v33 }
   0xa   :  { %v713_v13 = vld [vmem:[%s1630_s0 + $0x87] ss:$8 sm:$0xf0]   ;;  %v733_v36 = vld [vmem:[%s1630_s0 + $0x146] ss:$8 sm:$0xf0]  }
   0xb   :  { %v119_v14 = vsel %vm4_vm0, %v713_v13, %v712_v12  ;;  %v721_v15 = vld [vmem:[%s1630_s0 + $0x1c7] ss:$8 sm:$0xf]   ;;  %v735_v37 = vld [vmem:[%s1630_s0 + $0x86] ss:$8 sm:$0xf]   ;;  %v195_v40 = vsel %vm4_vm0, %v733_v36, %v732_v35 }
   0xc   :  { %109 = vrot.lane.b32.xlu1 %v108_v10, %s869_s14  ;;  %120 = vrot.lane.b32.xlu2 %v119_v14, %s869_s14  ;;  %v722_v16 = vld [vmem:[%s1630_s0 + $0x1c7] ss:$8 sm:$0xf0]   ;;  %v736_v38 = vld [vmem:[%s1630_s0 + $0x86] ss:$8 sm:$0xf0]  }
   0xd   :  { %v715_v17 = vld [vmem:[%s1630_s0 + $0x187] ss:$8 sm:$0xf]   ;;  %v152_v21 = vsel %vm4_vm0, %v722_v16, %v721_v15  ;;  %v206_v41 = vsel %vm4_vm0, %v736_v38, %v735_v37  ;;  %v747_v42 = vld [vmem:[%s1630_s0 + $0x5] ss:$8 sm:$0xf]  }
   0xe   :  { %87 = vrot.lane.b32.xlu0 %v86_v11, %s869_s14  ;;  %v716_v18 = vld [vmem:[%s1630_s0 + $0x187] ss:$8 sm:$0xf0]   ;;  %v748_v43 = vld [vmem:[%s1630_s0 + $0x5] ss:$8 sm:$0xf0]  }
   0xf   :  { %v718_v19 = vld [vmem:[%s1630_s0 + $0xc7] ss:$8 sm:$0xf]   ;;  %v130_v22 = vsel %vm4_vm0, %v716_v18, %v715_v17  ;;  %v741_v44 = vld [vmem:[%s1630_s0 + $0xc6] ss:$8 sm:$0xf]   ;;  %v250_v48 = vsel %vm4_vm0, %v748_v43, %v747_v42 }
  0x10   :  { %v719_v20 = vld [vmem:[%s1630_s0 + $0xc7] ss:$8 sm:$0xf0]   ;;  %v742_v45 = vld [vmem:[%s1630_s0 + $0xc6] ss:$8 sm:$0xf0]  }
  0x11   :  { %v141_v23 = vsel %vm4_vm0, %v719_v20, %v718_v19  ;;  %v744_v46 = vld [vmem:[%s1630_s0 + $0x1c6] ss:$8 sm:$0xf]   ;;  %v228_v49 = vsel %vm4_vm0, %v742_v45, %v741_v44  ;;  %s871_s18 = smov 80   ;;  %s872_s27 = smov 64   ;;  %vm253_vm4 = vcmask 786048  }
  0x12   :  { %v745_v47 = vld [vmem:[%s1630_s0 + $0x1c6] ss:$8 sm:$0xf0]   ;;  %v755_v51 = vld [vmem:[%s1630_s0 + $0x145] ss:$8 sm:$0xf]  }
  0x13   :  { %v239_v50 = vsel %vm4_vm0, %v745_v47, %v744_v46  ;;  %v756_v52 = vld [vmem:[%s1630_s0 + $0x145] ss:$8 sm:$0xf0]   ;;  %v772_v5 = vld [vmem:[%s1630_s0 + $0x104] ss:$8 sm:$0xf]  }
  0x14   :  { %153 = vrot.lane.b32.xlu1 %v152_v21, %s869_s14  ;;  %131 = vrot.lane.b32.xlu2 %v130_v22, %s869_s14  ;;  %v749_v53 = vld [vmem:[%s1630_s0 + $0x105] ss:$8 sm:$0xf]   ;;  %v282_v57 = vsel %vm4_vm0, %v756_v52, %v755_v51  ;;  %v773_v6 = vld [vmem:[%s1630_s0 + $0x104] ss:$8 sm:$0xf0]  }
  0x15   :  { %v750_v54 = vld [vmem:[%s1630_s0 + $0x105] ss:$8 sm:$0xf0]   ;;  %v770_v9 = vld [vmem:[%s1630_s0 + $0x4] ss:$8 sm:$0xf]   ;;  %v347_v11 = vsel %vm4_vm0, %v773_v6, %v772_v5 }
  0x16   :  { %142 = vrot.lane.b32.xlu0 %v141_v23, %s869_s14  ;;  %v752_v55 = vld [vmem:[%s1630_s0 + $0x45] ss:$8 sm:$0xf]   ;;  %v260_v58 = vsel %vm4_vm0, %v750_v54, %v749_v53  ;;  %v771_v10 = vld [vmem:[%s1630_s0 + $0x4] ss:$8 sm:$0xf0]  }
  0x17   :  { %v753_v56 = vld [vmem:[%s1630_s0 + $0x45] ss:$8 sm:$0xf0]   ;;  %v337_v13 = vsel %vm4_vm0, %v771_v10, %v770_v9  ;;  %v781_v14 = vld [vmem:[%s1630_s0 + $0x84] ss:$8 sm:$0xf]  }
  0x18   :  { %v271_v59 = vsel %vm4_vm0, %v753_v56, %v752_v55  ;;  %v764_v60 = vld [vmem:[%s1630_s0 + $0xc5] ss:$8 sm:$0xf]   ;;  %v782_v15 = vld [vmem:[%s1630_s0 + $0x84] ss:$8 sm:$0xf0]  }
  0x19   :  { %v765_v61 = vld [vmem:[%s1630_s0 + $0xc5] ss:$8 sm:$0xf0]   ;;  %v775_v16 = vld [vmem:[%s1630_s0 + $0x44] ss:$8 sm:$0xf]   ;;  %v380_v20 = vsel %vm4_vm0, %v782_v15, %v781_v14 }
  0x1a   :  { %v758_v62 = vld [vmem:[%s1630_s0 + $0x85] ss:$8 sm:$0xf]   ;;  %v315_v2 = vsel %vm4_vm0, %v765_v61, %v764_v60  ;;  %v776_v17 = vld [vmem:[%s1630_s0 + $0x44] ss:$8 sm:$0xf0]  }
  0x1b   :  { %v759_v63 = vld [vmem:[%s1630_s0 + $0x85] ss:$8 sm:$0xf0]   ;;  %v778_v18 = vld [vmem:[%s1630_s0 + $0x144] ss:$8 sm:$0xf]   ;;  %v358_v21 = vsel %vm4_vm0, %v776_v17, %v775_v16 }
  0x1c   :  { %185 = vrot.lane.b32.xlu1 %v184_v30, %s870_s22  ;;  %164 = vrot.lane.b32.xlu2 %v163_v31, %s870_s22  ;;  %v761_v0 = vld [vmem:[%s1630_s0 + $0x185] ss:$8 sm:$0xf]   ;;  %v293_v3 = vsel %vm4_vm0, %v759_v63, %v758_v62  ;;  %v779_v19 = vld [vmem:[%s1630_s0 + $0x144] ss:$8 sm:$0xf0]  }
  0x1d   :  { %v762_v1 = vld [vmem:[%s1630_s0 + $0x185] ss:$8 sm:$0xf0]   ;;  %v369_v22 = vsel %vm4_vm0, %v779_v19, %v778_v18  ;;  %v790_v23 = vld [vmem:[%s1630_s0 + $0x1c4] ss:$8 sm:$0xf]  }
  0x1e   :  { %174 = vrot.lane.b32.xlu0 %v173_v32, %s870_s22  ;;  %v304_v4 = vsel %vm4_vm0, %v762_v1, %v761_v0  ;;  %v767_v7 = vld [vmem:[%s1630_s0 + $0x1c5] ss:$8 sm:$0xf]   ;;  %v791_v24 = vld [vmem:[%s1630_s0 + $0x1c4] ss:$8 sm:$0xf0]  }
  0x1f   :  { %v768_v8 = vld [vmem:[%s1630_s0 + $0x1c5] ss:$8 sm:$0xf0]   ;;  %v784_v25 = vld [vmem:[%s1630_s0 + $0x184] ss:$8 sm:$0xf]   ;;  %v413_v29 = vsel %vm4_vm0, %v791_v24, %v790_v23 }
  0x20   :  { %v326_v12 = vsel %vm4_vm0, %v768_v8, %v767_v7  ;;  %v785_v26 = vld [vmem:[%s1630_s0 + $0x184] ss:$8 sm:$0xf0]   ;;  %v798_v32 = vld [vmem:[%s1630_s0 + $0x43] ss:$8 sm:$0xf]  }
  0x21   :  { %v787_v27 = vld [vmem:[%s1630_s0 + $0xc4] ss:$8 sm:$0xf]   ;;  %v391_v30 = vsel %vm4_vm0, %v785_v26, %v784_v25  ;;  %v799_v33 = vld [vmem:[%s1630_s0 + $0x43] ss:$8 sm:$0xf0]  }
  0x22   :  { %v788_v28 = vld [vmem:[%s1630_s0 + $0xc4] ss:$8 sm:$0xf0]   ;;  %v793_v34 = vld [vmem:[%s1630_s0 + $0x3] ss:$8 sm:$0xf]   ;;  %v445_v44 = vsel %vm4_vm0, %v799_v33, %v798_v32 }
  0x23   :  { %v402_v31 = vsel %vm4_vm0, %v788_v28, %v787_v27  ;;  %v794_v35 = vld [vmem:[%s1630_s0 + $0x3] ss:$8 sm:$0xf0]   ;;  %v680_v37 = vld [vmem:[%s1630_s0 + $0x40] ss:$8 sm:$0xf]  }
  0x24   :  { %218 = vrot.lane.b32.xlu1 %v217_v39, %s870_s22  ;;  %196 = vrot.lane.b32.xlu2 %v195_v40, %s870_s22  ;;  %v795_v36 = vld [vmem:[%s1630_s0 + $0x103] ss:$8 sm:$0xf]   ;;  %v681_v38 = vld [vmem:[%s1630_s0 + $0x40] ss:$8 sm:$0xf0]   ;;  %v424_v45 = vsel %vm4_vm0, %v794_v35, %v793_v34 }
  0x25   :  { %v2_v39 = vld [vmem:[%s1630_s0] ss:$8 sm:$0xf]   ;;  %v796_v40 = vld [vmem:[%s1630_s0 + $0x103] ss:$8 sm:$0xf0]  }
  0x26   :  { %207 = vrot.lane.b32.xlu0 %v206_v41, %s870_s22  ;;  %v13_v41 = vsel %vm4_vm0, %v681_v38, %v680_v37  ;;  %v3_v42 = vld [vmem:[%s1630_s0] ss:$8 sm:$0xf0]   ;;  %v434_v46 = vsel %vm4_vm0, %v796_v40, %v795_v36  ;;  %s873_s17 = smov 48   ;;  %s874_s25 = smov 32   ;;  %vm340_vm5 = vcmask 654848  }
  0x27   :  { %682 = vst.msk [vmem:[%s1631_s1 + $0x8] sm:$0xff] %vm6_vm1, %v13_v41   ;;  %v5_v43 = vsel %vm4_vm0, %v3_v42, %v2_v39  ;;  %v807_v47 = vld [vmem:[%s1630_s0 + $0x183] ss:$8 sm:$0xf]   ;;  %s875_s19 = smov 16   ;;  %vm427_vm6 = vcmask 523648  }
  0x28   :  { %7 = vst.msk [vmem:[%s1631_s1] sm:$0xff] %vm6_vm1, %v5_v43   ;;  %v804_v51 = vld [vmem:[%s1630_s0 + $0x83] ss:$8 sm:$0xf]   ;;  %vm514_vm7 = vcmask 392448   ;;  %vm601_vm8 = vcmask 261248  }
  0x29   :  { %v805_v52 = vld [vmem:[%s1630_s0 + $0x83] ss:$8 sm:$0xf0]   ;;  %v683_v53 = vld [vmem:[%s1630_s0 + $0x80] ss:$8 sm:$0xf]  }
  0x2a   :  { %v684_v54 = vld [vmem:[%s1630_s0 + $0x80] ss:$8 sm:$0xf0]   ;;  %v467_v0 = vsel %vm4_vm0, %v805_v52, %v804_v51  ;;  %v816_v1 = vld [vmem:[%s1630_s0 + $0x2] ss:$8 sm:$0xf]  }
  0x2b   :  { %v22_v55 = vsel %vm4_vm0, %v684_v54, %v683_v53  ;;  %v692_v56 = vld [vmem:[%s1630_s0 + $0x140] ss:$8 sm:$0xf]   ;;  %v813_v5 = vld [vmem:[%s1630_s0 + $0x1c3] ss:$8 sm:$0xf]  }
  0x2c   :  { %251 = vrot.lane.b32.xlu1 %v250_v48, %s871_s18  ;;  %229 = vrot.lane.b32.xlu2 %v228_v49, %s870_s22  ;;  %v808_v48 = vld [vmem:[%s1630_s0 + $0x183] ss:$8 sm:$0xf0]   ;;  %685 = vst.msk [vmem:[%s1631_s1 + $0x10] sm:$0xff] %vm6_vm1, %v22_v55  }
  0x2d   :  { %v801_v49 = vld [vmem:[%s1630_s0 + $0x143] ss:$8 sm:$0xf]   ;;  %v690_v60 = vld [vmem:[%s1630_s0 + $0x100] ss:$8 sm:$0xf0]   ;;  %v478_v61 = vsel %vm4_vm0, %v808_v48, %v807_v47 }
  0x2e   :  { %240 = vrot.lane.b32.xlu0 %v239_v50, %s870_s22  ;;  %v802_v50 = vld [vmem:[%s1630_s0 + $0x143] ss:$8 sm:$0xf0]   ;;  %v695_v7 = vld [vmem:[%s1630_s0 + $0x180] ss:$8 sm:$0xf]  }
  0x2f   :  { %v456_v62 = vsel %vm4_vm0, %v802_v50, %v801_v49  ;;  %v814_v6 = vld [vmem:[%s1630_s0 + $0x1c3] ss:$8 sm:$0xf0]   ;;  %v696_v8 = vld [vmem:[%s1630_s0 + $0x180] ss:$8 sm:$0xf0]  }
  0x30   :  { %v58_v10 = vsel %vm4_vm0, %v696_v8, %v695_v7  ;;  %v686_v14 = vld [vmem:[%s1630_s0 + $0xc0] ss:$8 sm:$0xf]   ;;  %v500_v19 = vsel %vm4_vm0, %v814_v6, %v813_v5  ;;  %v818_v24 = vld [vmem:[%s1630_s0 + $0x102] ss:$8 sm:$0xf]  }
  0x31   :  { %697 = vst.msk [vmem:[%s1631_s1 + $0x30] sm:$0xff] %vm6_vm1, %v58_v10   ;;  %v687_v15 = vld [vmem:[%s1630_s0 + $0xc0] ss:$8 sm:$0xf0]  }
  0x32   :  { %v31_v18 = vsel %vm4_vm0, %v687_v15, %v686_v14  ;;  %v819_v25 = vld [vmem:[%s1630_s0 + $0x102] ss:$8 sm:$0xf0]   ;;  %v841_v42 = vld [vmem:[%s1630_s0 + $0x101] ss:$8 sm:$0xf]  }
  0x33   :  { %688 = vst.msk [vmem:[%s1631_s1 + $0x18] sm:$0xff] %vm6_vm1, %v31_v18   ;;  %v822_v26 = vld [vmem:[%s1630_s0 + $0x42] ss:$8 sm:$0xf0]   ;;  %v521_v28 = vsel %vm4_vm0, %v819_v25, %v818_v24 }
  0x34   :  { %283 = vrot.lane.b32.xlu1 %v282_v57, %s871_s18  ;;  %261 = vrot.lane.b32.xlu2 %v260_v58, %s871_s18  ;;  %v693_v57 = vld [vmem:[%s1630_s0 + $0x140] ss:$8 sm:$0xf0]   ;;  %v830_v32 = vld [vmem:[%s1630_s0 + $0x182] ss:$8 sm:$0xf]  }
  0x35   :  { %v49_v58 = vsel %vm4_vm0, %v693_v57, %v692_v56  ;;  %v827_v35 = vld [vmem:[%s1630_s0 + $0x82] ss:$8 sm:$0xf]   ;;  %v842_v43 = vld [vmem:[%s1630_s0 + $0x101] ss:$8 sm:$0xf0]  }
  0x36   :  { %272 = vrot.lane.b32.xlu0 %v271_v59, %s871_s18  ;;  %v689_v59 = vld [vmem:[%s1630_s0 + $0x100] ss:$8 sm:$0xf]   ;;  %694 = vst.msk [vmem:[%s1631_s1 + $0x28] sm:$0xff] %vm6_vm1, %v49_v58   ;;  %v608_v51 = vsel %vm4_vm0, %v842_v43, %v841_v42 }
  0x37   :  { %v40_v63 = vsel %vm4_vm0, %v690_v60, %v689_v59  ;;  %v828_v36 = vld [vmem:[%s1630_s0 + $0x82] ss:$8 sm:$0xf0]   ;;  %v840_v50 = vld [vmem:[%s1630_s0 + $0x1] ss:$8 sm:$0xf0]  }
  0x38   :  { %691 = vst.msk [vmem:[%s1631_s1 + $0x20] sm:$0xff] %vm6_vm1, %v40_v63   ;;  %v831_v38 = vld [vmem:[%s1630_s0 + $0x182] ss:$8 sm:$0xf0]   ;;  %v554_v40 = vsel %vm4_vm0, %v828_v36, %v827_v35 }
  0x39   :  { %v565_v41 = vsel %vm4_vm0, %v831_v38, %v830_v32  ;;  %v836_v47 = vld [vmem:[%s1630_s0 + $0x1c2] ss:$8 sm:$0xf]   ;;  %v850_v54 = vld [vmem:[%s1630_s0 + $0x81] ss:$8 sm:$0xf]  }
  0x3a   :  { %v837_v48 = vld [vmem:[%s1630_s0 + $0x1c2] ss:$8 sm:$0xf0]   ;;  %v851_v55 = vld [vmem:[%s1630_s0 + $0x81] ss:$8 sm:$0xf0]  }
  0x3b   :  { %v587_v52 = vsel %vm4_vm0, %v837_v48, %v836_v47  ;;  %v847_v56 = vld [vmem:[%s1630_s0 + $0x141] ss:$8 sm:$0xf]   ;;  %v641_v63 = vsel %vm4_vm0, %v851_v55, %v850_v54 }
  0x3c   :  { %316 = vrot.lane.b32.xlu1 %v315_v2, %s871_s18  ;;  %294 = vrot.lane.b32.xlu2 %v293_v3, %s871_s18  ;;  %v817_v2 = vld [vmem:[%s1630_s0 + $0x2] ss:$8 sm:$0xf0]   ;;  %v810_v3 = vld [vmem:[%s1630_s0 + $0xc3] ss:$8 sm:$0xf]  }
  0x3d   :  { %v511_v16 = vsel %vm4_vm0, %v817_v2, %v816_v1  ;;  %v844_v59 = vld [vmem:[%s1630_s0 + $0x41] ss:$8 sm:$0xf]  }
  0x3e   :  { %305 = vrot.lane.b32.xlu0 %v304_v4, %s871_s18  ;;  %v811_v4 = vld [vmem:[%s1630_s0 + $0xc3] ss:$8 sm:$0xf0]   ;;  %v845_v60 = vld [vmem:[%s1630_s0 + $0x41] ss:$8 sm:$0xf0]  }
  0x3f   :  { %v489_v17 = vsel %vm4_vm0, %v811_v4, %v810_v3  ;;  %v859_v2 = vld [vmem:[%s1630_s0 + $0x1c1] ss:$8 sm:$0xf]  }
  0x40   :  { %v860_v3 = vld [vmem:[%s1630_s0 + $0x1c1] ss:$8 sm:$0xf0]  }
  0x41   :  { %v856_v4 = vld [vmem:[%s1630_s0 + $0xc1] ss:$8 sm:$0xf]  }
  0x42   :  { %v853_v7 = vld [vmem:[%s1630_s0 + $0x181] ss:$8 sm:$0xf]  }
  0x43   :  { %v854_v8 = vld [vmem:[%s1630_s0 + $0x181] ss:$8 sm:$0xf0]  }
  0x44   :  { %348 = vrot.lane.b32.xlu1 %v347_v11, %s872_s27  ;;  %327 = vrot.lane.b32.xlu2 %v326_v12, %s871_s18  ;;  %v698_v11 = vld [vmem:[%s1630_s0 + $0x1c0] ss:$8 sm:$0xf]   ;;  %v857_v10 = vld [vmem:[%s1630_s0 + $0xc1] ss:$8 sm:$0xf0]  }
  0x45   :  { %v699_v12 = vld [vmem:[%s1630_s0 + $0x1c0] ss:$8 sm:$0xf0]  }
  0x46   :  { %338 = vrot.lane.b32.xlu0 %v337_v13, %s872_s27  ;;  %v67_v13 = vsel %vm4_vm0, %v699_v12, %v698_v11  ;;  %v674_v11 = vsel %vm4_vm0, %v860_v3, %v859_v2  ;;  %v652_v12 = vsel %vm4_vm0, %v854_v8, %v853_v7 }
  0x47   :  { %700 = vst.msk [vmem:[%s1631_s1 + $0x38] sm:$0xff] %vm6_vm1, %v67_v13   ;;  %v663_v13 = vsel %vm4_vm0, %v857_v10, %v856_v4 }
  0x4c   :  { %381 = vrot.lane.b32.xlu1 %v380_v20, %s872_s27  ;;  %359 = vrot.lane.b32.xlu2 %v358_v21, %s872_s27  ;;  %v824_v20 = vld [vmem:[%s1630_s0 + $0x142] ss:$8 sm:$0xf]  }
  0x4d   :  { %v825_v21 = vld [vmem:[%s1630_s0 + $0x142] ss:$8 sm:$0xf0]  }
  0x4e   :  { %370 = vrot.lane.b32.xlu0 %v369_v22, %s872_s27  ;;  %v821_v22 = vld [vmem:[%s1630_s0 + $0x42] ss:$8 sm:$0xf]   ;;  %v543_v27 = vsel %vm4_vm0, %v825_v21, %v824_v20 }
  0x54   :  { %414 = vrot.lane.b32.xlu1 %v413_v29, %s872_s27  ;;  %392 = vrot.lane.b32.xlu2 %v391_v30, %s872_s27  ;;  %v532_v29 = vsel %vm4_vm0, %v822_v26, %v821_v22  ;;  %v833_v30 = vld [vmem:[%s1630_s0 + $0xc2] ss:$8 sm:$0xf]  }
  0x56   :  { %403 = vrot.lane.b32.xlu0 %v402_v31, %s872_s27  ;;  %v834_v31 = vld [vmem:[%s1630_s0 + $0xc2] ss:$8 sm:$0xf0]  }
  0x57   :  { %v576_v39 = vsel %vm4_vm0, %v834_v31, %v833_v30 }
  0x5c   :  { %446 = vrot.lane.b32.xlu1 %v445_v44, %s873_s17  ;;  %425 = vrot.lane.b32.xlu2 %v424_v45, %s873_s17  ;;  %v839_v44 = vld [vmem:[%s1630_s0 + $0x1] ss:$8 sm:$0xf]  }
  0x5d   :  { %v598_v53 = vsel %vm4_vm0, %v840_v50, %v839_v44 }
  0x5e   :  { %435 = vrot.lane.b32.xlu0 %v434_v46, %s873_s17 }
  0x64   :  { %479 = vrot.lane.b32.xlu1 %v478_v61, %s873_s17  ;;  %457 = vrot.lane.b32.xlu2 %v456_v62, %s873_s17  ;;  %v848_v62 = vld [vmem:[%s1630_s0 + $0x141] ss:$8 sm:$0xf0]  }
  0x65   :  { %v630_v1 = vsel %vm4_vm0, %v848_v62, %v847_v56 }
  0x66   :  { %468 = vrot.lane.b32.xlu0 %v467_v0, %s873_s17  ;;  %v121_v9 = vpop.permute.xlu2 %120   ;;  %v619_v0 = vsel %vm4_vm0, %v845_v60, %v844_v59 }
  0x67   :  { %714 = vst.msk [vmem:[%s1631_s1 + $0x10] sm:$0xff] %vm79_vm2, %v121_v9  }
  0x6c   :  { %512 = vrot.lane.b32.xlu1 %v511_v16, %s874_s25  ;;  %490 = vrot.lane.b32.xlu2 %v489_v17, %s873_s17 }
  0x6e   :  { %501 = vrot.lane.b32.xlu0 %v500_v19, %s873_s17  ;;  %v132_v23 = vpop.permute.xlu2 %131  }
  0x6f   :  { %717 = vst.msk [vmem:[%s1631_s1 + $0x30] sm:$0xff] %vm79_vm2, %v132_v23  }
  0x74   :  { %544 = vrot.lane.b32.xlu1 %v543_v27, %s874_s25  ;;  %522 = vrot.lane.b32.xlu2 %v521_v28, %s874_s25 }
  0x76   :  { %533 = vrot.lane.b32.xlu0 %v532_v29, %s874_s25  ;;  %v99_v33 = vpop.permute.xlu1 %98   ;;  %v165_v34 = vpop.permute.xlu2 %164  }
  0x77   :  { %708 = vst.msk [vmem:[%s1631_s1 + $0x8] sm:$0xff] %vm79_vm2, %v99_v33  }
  0x78   :  { %v78_v37 = vpop.permute.xlu0 %77  }
  0x79   :  { %80 = vst.msk [vmem:[%s1631_s1] sm:$0xff] %vm79_vm2, %v78_v37  }
  0x7a   :  { %167 = vst.msk [vmem:[%s1631_s1] sm:$0xff] %vm166_vm3, %v165_v34  }
  0x7c   :  { %577 = vrot.lane.b32.xlu1 %v576_v39, %s874_s25  ;;  %555 = vrot.lane.b32.xlu2 %v554_v40, %s874_s25 }
  0x7e   :  { %566 = vrot.lane.b32.xlu0 %v565_v41, %s874_s25  ;;  %v110_v45 = vpop.permute.xlu1 %109   ;;  %v197_v46 = vpop.permute.xlu2 %196  }
  0x7f   :  { %711 = vst.msk [vmem:[%s1631_s1 + $0x28] sm:$0xff] %vm79_vm2, %v110_v45  }
  0x80   :  { %v88_v49 = vpop.permute.xlu0 %87   ;;  %734 = vst.msk [vmem:[%s1631_s1 + $0x28] sm:$0xff] %vm166_vm3, %v197_v46  }
  0x81   :  { %705 = vst.msk [vmem:[%s1631_s1 + $0x20] sm:$0xff] %vm79_vm2, %v88_v49  }
  0x84   :  { %609 = vrot.lane.b32.xlu1 %v608_v51, %s875_s19  ;;  %588 = vrot.lane.b32.xlu2 %v587_v52, %s874_s25 }
  0x86   :  { %599 = vrot.lane.b32.xlu0 %v598_v53, %s875_s19  ;;  %v154_v57 = vpop.permute.xlu1 %153   ;;  %v230_v58 = vpop.permute.xlu2 %229  }
  0x87   :  { %723 = vst.msk [vmem:[%s1631_s1 + $0x38] sm:$0xff] %vm79_vm2, %v154_v57  }
  0x88   :  { %v143_v61 = vpop.permute.xlu0 %142  }
  0x89   :  { %720 = vst.msk [vmem:[%s1631_s1 + $0x18] sm:$0xff] %vm79_vm2, %v143_v61  }
  0x8a   :  { %743 = vst.msk [vmem:[%s1631_s1 + $0x18] sm:$0xff] %vm166_vm3, %v230_v58  }
  0x8c   :  { %642 = vrot.lane.b32.xlu1 %v641_v63, %s875_s19  ;;  %620 = vrot.lane.b32.xlu2 %v619_v0, %s875_s19 }
  0x8e   :  { %631 = vrot.lane.b32.xlu0 %v630_v1, %s875_s19  ;;  %v186_v5 = vpop.permute.xlu1 %185   ;;  %v262_v6 = vpop.permute.xlu2 %261  }
  0x8f   :  { %731 = vst.msk [vmem:[%s1631_s1 + $0x8] sm:$0xff] %vm166_vm3, %v186_v5  }
  0x90   :  { %v175_v9 = vpop.permute.xlu0 %174  }
  0x91   :  { %728 = vst.msk [vmem:[%s1631_s1 + $0x20] sm:$0xff] %vm166_vm3, %v175_v9  }
  0x92   :  { %751 = vst.msk [vmem:[%s1631_s1 + $0x20] sm:$0xff] %vm253_vm4, %v262_v6  }
  0x94   :  { %675 = vrot.lane.b32.xlu1 %v674_v11, %s875_s19  ;;  %653 = vrot.lane.b32.xlu2 %v652_v12, %s875_s19 }
  0x96   :  { %664 = vrot.lane.b32.xlu0 %v663_v13, %s875_s19  ;;  %v219_v14 = vpop.permute.xlu1 %218   ;;  %v295_v15 = vpop.permute.xlu2 %294  }
  0x97   :  { %740 = vst.msk [vmem:[%s1631_s1 + $0x30] sm:$0xff] %vm166_vm3, %v219_v14  }
  0x98   :  { %v208_v16 = vpop.permute.xlu0 %207  }
  0x99   :  { %737 = vst.msk [vmem:[%s1631_s1 + $0x10] sm:$0xff] %vm166_vm3, %v208_v16  }
  0x9a   :  { %760 = vst.msk [vmem:[%s1631_s1 + $0x10] sm:$0xff] %vm253_vm4, %v295_v15  }
  0x9e   :  { %v252_v17 = vpop.permute.xlu1 %251   ;;  %v328_v18 = vpop.permute.xlu2 %327  }
  0x9f   :  { %254 = vst.msk [vmem:[%s1631_s1] sm:$0xff] %vm253_vm4, %v252_v17  }
  0xa0   :  { %v241_v19 = vpop.permute.xlu0 %240  }
  0xa1   :  { %746 = vst.msk [vmem:[%s1631_s1 + $0x38] sm:$0xff] %vm166_vm3, %v241_v19  }
  0xa2   :  { %769 = vst.msk [vmem:[%s1631_s1 + $0x38] sm:$0xff] %vm253_vm4, %v328_v18  }
  0xa6   :  { %v284_v20 = vpop.permute.xlu1 %283   ;;  %v360_v21 = vpop.permute.xlu2 %359  }
  0xa7   :  { %757 = vst.msk [vmem:[%s1631_s1 + $0x28] sm:$0xff] %vm253_vm4, %v284_v20  }
  0xa8   :  { %v273_v22 = vpop.permute.xlu0 %272  }
  0xa9   :  { %754 = vst.msk [vmem:[%s1631_s1 + $0x8] sm:$0xff] %vm253_vm4, %v273_v22  }
  0xaa   :  { %777 = vst.msk [vmem:[%s1631_s1 + $0x8] sm:$0xff] %vm340_vm5, %v360_v21  }
  0xae   :  { %v317_v23 = vpop.permute.xlu1 %316   ;;  %v393_v24 = vpop.permute.xlu2 %392  }
  0xaf   :  { %766 = vst.msk [vmem:[%s1631_s1 + $0x18] sm:$0xff] %vm253_vm4, %v317_v23  }
  0xb0   :  { %v306_v25 = vpop.permute.xlu0 %305  }
  0xb1   :  { %763 = vst.msk [vmem:[%s1631_s1 + $0x30] sm:$0xff] %vm253_vm4, %v306_v25  }
  0xb2   :  { %786 = vst.msk [vmem:[%s1631_s1 + $0x30] sm:$0xff] %vm340_vm5, %v393_v24  }
  0xb6   :  { %v349_v26 = vpop.permute.xlu1 %348   ;;  %v426_v27 = vpop.permute.xlu2 %425  }
  0xb7   :  { %774 = vst.msk [vmem:[%s1631_s1 + $0x20] sm:$0xff] %vm340_vm5, %v349_v26  }
  0xb8   :  { %v339_v28 = vpop.permute.xlu0 %338  }
  0xb9   :  { %341 = vst.msk [vmem:[%s1631_s1] sm:$0xff] %vm340_vm5, %v339_v28  }
  0xba   :  { %428 = vst.msk [vmem:[%s1631_s1] sm:$0xff] %vm427_vm6, %v426_v27  }
  0xbe   :  { %v382_v29 = vpop.permute.xlu1 %381   ;;  %v458_v30 = vpop.permute.xlu2 %457  }
  0xbf   :  { %783 = vst.msk [vmem:[%s1631_s1 + $0x10] sm:$0xff] %vm340_vm5, %v382_v29  }
  0xc0   :  { %v371_v31 = vpop.permute.xlu0 %370  }
  0xc1   :  { %780 = vst.msk [vmem:[%s1631_s1 + $0x28] sm:$0xff] %vm340_vm5, %v371_v31  }
  0xc2   :  { %803 = vst.msk [vmem:[%s1631_s1 + $0x28] sm:$0xff] %vm427_vm6, %v458_v30  }
  0xc6   :  { %v415_v32 = vpop.permute.xlu1 %414   ;;  %v491_v33 = vpop.permute.xlu2 %490  }
  0xc7   :  { %792 = vst.msk [vmem:[%s1631_s1 + $0x38] sm:$0xff] %vm340_vm5, %v415_v32  }
  0xc8   :  { %v404_v34 = vpop.permute.xlu0 %403  }
  0xc9   :  { %789 = vst.msk [vmem:[%s1631_s1 + $0x18] sm:$0xff] %vm340_vm5, %v404_v34  }
  0xca   :  { %812 = vst.msk [vmem:[%s1631_s1 + $0x18] sm:$0xff] %vm427_vm6, %v491_v33  }
  0xce   :  { %v447_v35 = vpop.permute.xlu1 %446   ;;  %v523_v36 = vpop.permute.xlu2 %522  }
  0xcf   :  { %800 = vst.msk [vmem:[%s1631_s1 + $0x8] sm:$0xff] %vm427_vm6, %v447_v35  }
  0xd0   :  { %v436_v37 = vpop.permute.xlu0 %435  }
  0xd1   :  { %797 = vst.msk [vmem:[%s1631_s1 + $0x20] sm:$0xff] %vm427_vm6, %v436_v37  }
  0xd2   :  { %820 = vst.msk [vmem:[%s1631_s1 + $0x20] sm:$0xff] %vm514_vm7, %v523_v36  }
  0xd6   :  { %v480_v38 = vpop.permute.xlu1 %479   ;;  %v556_v39 = vpop.permute.xlu2 %555  }
  0xd7   :  { %809 = vst.msk [vmem:[%s1631_s1 + $0x30] sm:$0xff] %vm427_vm6, %v480_v38  }
  0xd8   :  { %v469_v40 = vpop.permute.xlu0 %468  }
  0xd9   :  { %806 = vst.msk [vmem:[%s1631_s1 + $0x10] sm:$0xff] %vm427_vm6, %v469_v40  }
  0xda   :  { %829 = vst.msk [vmem:[%s1631_s1 + $0x10] sm:$0xff] %vm514_vm7, %v556_v39  }
  0xde   :  { %v513_v41 = vpop.permute.xlu1 %512   ;;  %v589_v42 = vpop.permute.xlu2 %588  }
  0xdf   :  { %515 = vst.msk [vmem:[%s1631_s1] sm:$0xff] %vm514_vm7, %v513_v41  }
  0xe0   :  { %v502_v43 = vpop.permute.xlu0 %501  }
  0xe1   :  { %815 = vst.msk [vmem:[%s1631_s1 + $0x38] sm:$0xff] %vm427_vm6, %v502_v43  }
  0xe2   :  { %838 = vst.msk [vmem:[%s1631_s1 + $0x38] sm:$0xff] %vm514_vm7, %v589_v42  }
  0xe6   :  { %v545_v44 = vpop.permute.xlu1 %544   ;;  %v621_v45 = vpop.permute.xlu2 %620  }
  0xe7   :  { %826 = vst.msk [vmem:[%s1631_s1 + $0x28] sm:$0xff] %vm514_vm7, %v545_v44  }
  0xe8   :  { %v534_v46 = vpop.permute.xlu0 %533  }
  0xe9   :  { %823 = vst.msk [vmem:[%s1631_s1 + $0x8] sm:$0xff] %vm514_vm7, %v534_v46  }
  0xea   :  { %846 = vst.msk [vmem:[%s1631_s1 + $0x8] sm:$0xff] %vm601_vm8, %v621_v45  }
  0xee   :  { %v578_v47 = vpop.permute.xlu1 %577   ;;  %v654_v48 = vpop.permute.xlu2 %653  }
  0xef   :  { %835 = vst.msk [vmem:[%s1631_s1 + $0x18] sm:$0xff] %vm514_vm7, %v578_v47  }
  0xf0   :  { %v567_v49 = vpop.permute.xlu0 %566  }
  0xf1   :  { %832 = vst.msk [vmem:[%s1631_s1 + $0x30] sm:$0xff] %vm514_vm7, %v567_v49  }
  0xf2   :  { %855 = vst.msk [vmem:[%s1631_s1 + $0x30] sm:$0xff] %vm601_vm8, %v654_v48  }
  0xf6   :  { %v610_v50 = vpop.permute.xlu1 %609  }
  0xf7   :  { %843 = vst.msk [vmem:[%s1631_s1 + $0x20] sm:$0xff] %vm601_vm8, %v610_v50  }
  0xf8   :  { %v600_v51 = vpop.permute.xlu0 %599  }
  0xf9   :  { %602 = vst.msk [vmem:[%s1631_s1] sm:$0xff] %vm601_vm8, %v600_v51  }
  0xfe   :  { %v643_v52 = vpop.permute.xlu1 %642  }
  0xff   :  { %852 = vst.msk [vmem:[%s1631_s1 + $0x10] sm:$0xff] %vm601_vm8, %v643_v52  }
 0x100   :  { %v632_v53 = vpop.permute.xlu0 %631  }
 0x101   :  { %849 = vst.msk [vmem:[%s1631_s1 + $0x28] sm:$0xff] %vm601_vm8, %v632_v53  }
 0x106   :  { %v676_v54 = vpop.permute.xlu1 %675  }
 0x107   :  { %861 = vst.msk [vmem:[%s1631_s1 + $0x38] sm:$0xff] %vm601_vm8, %v676_v54  }
 0x108   :  { %v665_v55 = vpop.permute.xlu0 %664  }
 0x109   :  { %858 = vst.msk [vmem:[%s1631_s1 + $0x18] sm:$0xff] %vm601_vm8, %v665_v55  }

// kernel: mask_gat_forward.1
= control target key start
LH: loop header
LB: loop body
LE: loop exit
PB: predicated region body
PF: predicated region fallthrough
CT: control target
= control target key end

     0   :  { %11 = vsyncpa [#allocation3], 0  ;;  %s2002_s0 = inlined_call_operand.vmem [shape: f32[4,16,64], index: 0, kind: input, shape index: {}]   ;;  %s2003_s1 = inlined_call_operand.vmem [shape: f32[4,16,128], index: 1, kind: input, shape index: {}]   ;;  %s2004_s2 = inlined_call_operand.vmem [shape: f32[336,128], index: 2, kind: input, shape index: {}]   ;;  %s2005_s3 = inlined_call_operand.vmem [shape: f32[9,64], index: 3, kind: input, shape index: {}]   ;;  %s2006_s4 = inlined_call_operand.vmem [shape: f32[2,64,64], index: 4, kind: input, shape index: {}]   ;;  %s2007_s5 = inlined_call_operand.vmem [shape: f32[64,4], index: 5, kind: input, shape index: {}]   ;;  %s2008_s6 = inlined_call_operand.hbm [shape: f32[4,1,4], index: 6, kind: output, shape index: {}]  }
   0x1   :  { %13 = vsyncpa [#allocation3 + $0x1], 0  ;;  %s1343_s21 = smov 0   ;;  %s1345_s22 = smov 0  }
   0x2   :  { %s1347_s23 = smov 0   ;;  %s1349_s24 = smov 0  }
   0x3 LB: > { %s1364_s25 = sadd.s32 4294967295, %s1305_s24   ;;  %s1091_s26 = sadd.s32 4294967294, %s1305_s24   ;;  %s1305_s24 = sphi %s1349_s24, %s2020_s24   ;;  %s1301_s23 = sphi %s1347_s23, %s2019_s23   ;;  %s1297_s22 = sphi %s1345_s22, %s2018_s22   ;;  %s1293_s21 = sphi %s1343_s21, %s2017_s21  }
   0x4   : > { %s1368_s27 = sadd.s32 1, %s1305_s24   ;;  %s162_s28 = sadd.s32 1, %s1301_s23 }
   0x5   : > { %s159_s29 = ssub.s32 %s1305_s24, %s1368_s27  ;;  %p172_p0 = scmp.ne.s32.totalorder %s1301_s23, %s1297_s22 }
   0x6   : > { %p160_p1 = scmp.eq.s32.totalorder %s159_s29, 0  ;;  %p173_p2 = scmp.eq.s32.totalorder %s1364_s25, 3 }
   0x7   : > { %p178_p3 = scmp.ne.s32.totalorder %s1297_s22, %s1293_s21  ;;  %p179_p4 = scmp.eq.s32.totalorder %s1091_s26, 3 }
   0x8   : > { %s1379_s30 = scalar_select %p160_p1, %s1301_s23, %s162_s28  }
   0x9   : > { %p1381_p5 = por %p173_p2, %p172_p0  ;;  %p1385_p6 = por %p179_p4, %p178_p3 }
   0xa   : > { %p1094_p7 = scmp.ge.s32.totalorder %s1305_s24, 1  ;;  %p225_p8 = scmp.lt.s32.totalorder %s1305_s24, 5 }
   0xc   : > { %p226_p9 = pnand %p1094_p7, %p225_p8 }
   0xe   : > { %229 = sbr.rel (%p226_p9) target bundleno = 1897 (0x769), region = 44 }
  0x13   : > { %v326_v0 = vld [vmem:[%s2006_s4 + $0x38] sm:$0xff]  ;;  %v325_v1 = vld [vmem:[%s2006_s4 + $0x30] sm:$0xff]  ;;  %p259_p10 = scmp.lt.s32.totalorder %s1364_s25, 3  ;;  %v324_v2 = vld [vmem:[%s2006_s4 + $0x28] sm:$0xff]  ;;  %vm327_vm0 = vcmask 523264   ;;  %vm394_vm1 = vcmask 130048   ;;  %s1020_s16 = scalar_lea.hbm %s2008_s6, %s1364_s25 }
  0x14   : > { %342 = vmatpush.msra.mxu1 %v326_v0  ;;  %v1407_v3 = vld [vmem:[%s2004_s2 + $0x38] sm:$0xff]  ;;  %v1413_v4 = vld [vmem:[%s2004_s2 + $0x30] sm:$0xff]  ;;  %v323_v5 = vld [vmem:[%s2006_s4 + $0x20] sm:$0xff]  ;;  %v2009_v49 = vmov 1.0   ;;  %s1024_s26 = sshll.u32 %s1020_s16, 4  ;;  %vm1009_vm10 = vcmask 24576   ;;  %s1025_s26 = int_to_ptr.hbm [resolvable:$true] %s1024_s26 }
  0x15   : > { %s1402_s15 = scalar_select %p259_p10, %s1364_s25, 3  ;;  %435 = vmatpush.msra.mxu3 %v1407_v3  ;;  %v1421_v6 = vld [vmem:[%s2004_s2 + $0x28] sm:$0xff]  ;;  %v322_v7 = vld [vmem:[%s2006_s4 + $0x18] sm:$0xff]  ;;  %v1431_v8 = vld [vmem:[%s2004_s2 + $0x20] sm:$0xff] }
  0x16   : > { %343 = vmatpush.msra.mxu1 %v325_v1  ;;  %v321_v9 = vld [vmem:[%s2006_s4 + $0x10] sm:$0xff]  ;;  %v1440_v10 = vld [vmem:[%s2004_s2 + $0x18] sm:$0xff]  ;;  %v320_v11 = vld [vmem:[%s2006_s4 + $0x8] sm:$0xff]  ;;  %s1263_s12 = scalar_lea.hbm %s2008_s6, 4 }
  0x17   : > { %436 = vmatpush.msra.mxu3 %v1413_v4  ;;  %s1159_s11 = sshll.u32 %s1402_s15, 4  ;;  %v1454_v12 = vld [vmem:[%s2004_s2 + $0x10] sm:$0xff]  ;;  %v319_v13 = vld [vmem:[%s2006_s4] sm:$0xff]  ;;  %v1472_v16 = vld [vmem:[%s2004_s2 + $0x8] sm:$0xff] }
  0x18   : > { %344 = vmatpush.msra.mxu1 %v324_v2  ;;  %s263_s29 = scalar_lea.vmem %s2002_s0, %s1159_s11  ;;  %v1479_v17 = vld [vmem:[%s2004_s2] sm:$0xff]  ;;  %v1494_v26 = vld [vmem:[%s2004_s2 + $0xd0] sm:$0xff]  ;;  %v1503_v27 = vld [vmem:[%s2004_s2 + $0xd8] sm:$0xff]  ;;  %s268_s14 = scalar_lea.vmem %s2003_s1, %s1159_s11 }
  0x19   : > { %437 = vmatpush.msra.mxu3 %v1421_v6  ;;  %v313_v14 = vld [vmem:[%s263_s29] sm:$0xff]  ;;  %v314_v15 = vld [vmem:[%s263_s29 + $0x8] sm:$0xff]  ;;  %v1524_v30 = vld [vmem:[%s2004_s2 + $0xf0] sm:$0xff]  ;;  %s1257_s29 = sshra.s32 %s1025_s26, 4  ;;  %s1258_s29 = int_to_ptr.hbm [resolvable:$true] %s1257_s29 }
  0x1a   : > { %345 = vmatpush.msra.mxu1 %v323_v5  ;;  %v1219_v18 = vld [vmem:[%s2005_s3 + $0x1] ss:$0 sm:$0xff]  ;;  %v1220_v19 = vld [vmem:[%s2005_s3] ss:$0 sm:$0xff]  ;;  %v1517_v29 = vld [vmem:[%s2004_s2 + $0xe8] sm:$0xff]  ;;  %s1259_s9 = scalar_lea.hbm %s1258_s29, 1  ;;  %p1264_p0 = scmp.lt.s32.totalorder %s1258_s29, %s2008_s6 }
  0x1b   : > { %438 = vmatpush.msra.mxu3 %v1431_v8  ;;  %v1510_v28 = vld [vmem:[%s2004_s2 + $0xe0] sm:$0xff]  ;;  %v1531_v31 = vld [vmem:[%s2004_s2 + $0xf8] sm:$0xff]  ;;  %v1545_v33 = vld [vmem:[%s2004_s2 + $0x108] sm:$0xff]  ;;  %p1260_p11 = scmp.ne.s32.totalorder %s1258_s29, %s1259_s9  ;;  %p1265_p1 = scmp.lt.s32.totalorder %s1263_s12, %s1259_s9 }
  0x1c   : > { %346 = vmatpush.msra.mxu1 %v322_v7  ;;  %v1538_v32 = vld [vmem:[%s2004_s2 + $0x100] sm:$0xff]  ;;  %v1552_v34 = vld [vmem:[%s2004_s2 + $0x110] sm:$0xff]  ;;  %v1559_v35 = vld [vmem:[%s2004_s2 + $0x118] sm:$0xff] }
  0x1d   : > { %439 = vmatpush.msra.mxu3 %v1440_v10  ;;  %v1566_v36 = vld [vmem:[%s2004_s2 + $0x120] sm:$0xff]  ;;  %v1573_v37 = vld [vmem:[%s2004_s2 + $0x128] sm:$0xff]  ;;  %v1580_v38 = vld [vmem:[%s2004_s2 + $0x130] sm:$0xff]  ;;  %p1261_p12 = pnand %p1260_p11, %p1381_p5  ;;  %p1266_p2 = por %p1265_p1, %p1264_p0 }
  0x1e   : > { %347 = vmatpush.msra.mxu1 %v321_v9  ;;  %v1587_v39 = vld [vmem:[%s2004_s2 + $0x138] sm:$0xff]  ;;  %v1594_v40 = vld [vmem:[%s2004_s2 + $0x140] sm:$0xff]  ;;  %v1601_v42 = vld [vmem:[%s2004_s2 + $0x148] sm:$0xff] }
  0x1f   : > { %440 = vmatpush.msra.mxu3 %v1454_v12  ;;  %2014 = vst [vmem:[#allocation5_spill] sm:$0xff] %v1601_v42  ;;  %v1608_v43 = vld [vmem:[%s2004_s2 + $0x48] sm:$0xff]  ;;  %v1613_v44 = vld [vmem:[%s2004_s2 + $0x40] sm:$0xff]  ;;  %v1658_v62 = vld [vmem:[%s2004_s2 + $0xb8] sm:$0xff]  ;;  %p1262_p13 = pneg %p1261_p12 }
  0x20   : > { %348 = vmatpush.msra.mxu1 %v320_v11  ;;  %v1644_v60 = vld [vmem:[%s2004_s2 + $0xc8] sm:$0xff]  ;;  %v1651_v61 = vld [vmem:[%s2004_s2 + $0xc0] sm:$0xff]  ;;  %v1665_v63 = vld [vmem:[%s2004_s2 + $0xb0] sm:$0xff] }
  0x21   : > { %441 = vmatpush.msra.mxu3 %v1472_v16  ;;  %v1672_v1 = vld [vmem:[%s2004_s2 + $0xa8] sm:$0xff]  ;;  %v1679_v2 = vld [vmem:[%s2004_s2 + $0xa0] sm:$0xff]  ;;  %v1686_v5 = vld [vmem:[%s2004_s2 + $0x98] sm:$0xff]  ;;  %p1267_p3 = pnand %p1266_p2, %p1262_p13 }
  0x22   : > { %349 = vmatpush.msra.mxu1 %v319_v13  ;;  %v1693_v7 = vld [vmem:[%s2004_s2 + $0x90] sm:$0xff]  ;;  %v1700_v11 = vld [vmem:[%s2004_s2 + $0x88] sm:$0xff]  ;;  %v1707_v13 = vld [vmem:[%s2004_s2 + $0x80] sm:$0xff] }
  0x23   : > { %1099 = vmatmul.msk.f32.vlgmr.msra.gmra.mxu1 %vm327_vm0, %v313_v14  ;;  %442 = vmatpush.msra.mxu3 %v1479_v17  ;;  %v1714_v14 = vld [vmem:[%s2004_s2 + $0x78] sm:$0xff] }
  0x24   : > { %377 = vmatpush.msrb.mxu1 %v1407_v3 }
  0x26   : > { %378 = vmatpush.msrb.mxu1 %v1413_v4 }
  0x28   : > { %379 = vmatpush.msrb.mxu1 %v1421_v6 }
  0x2a   : > { %380 = vmatpush.msrb.mxu1 %v1431_v8 }
  0x2b   : > { %1100 = vmatmul.msk.f32.gmra.mxu1 %vm327_vm0, %v314_v15  ;;  %v1721_v15 = vld [vmem:[%s2004_s2 + $0x70] sm:$0xff] }
  0x2c   : > { %381 = vmatpush.msrb.mxu1 %v1440_v10 }
  0x2e   : > { %382 = vmatpush.msrb.mxu1 %v1454_v12 }
  0x30   : > { %383 = vmatpush.msrb.mxu1 %v1472_v16 }
  0x32   : > { %384 = vmatpush.msrb.mxu1 %v1479_v17 }
  0xa0   : > { %v351_v20 = vpop.f32.mrf.mxu1 }
  0xa1   : > { %v358_v21 = vmul.f32 %v1219_v18, %v351_v20  ;;  %v361_v22 = vmul.f32 %v1220_v19, %v351_v20 }
  0xa3   : > { %1101 = vmatmul.msk.f32.vlgmr.msrb.gmra.mxu1 %vm327_vm0, %v361_v22  ;;  %1105 = vmatmul.msk.f32.vlgmr.msra.gmra.mxu3 %vm327_vm0, %v358_v21  ;;  %v1742_v21 = vld [vmem:[%s2004_s2 + $0x58] sm:$0xff]  ;;  %v1749_v22 = vld [vmem:[%s2004_s2 + $0x50] sm:$0xff] }
  0xa8   : > { %v354_v23 = vpop.f32.mrf.mxu1 }
  0xa9   : > { %v359_v24 = vmul.f32 %v1219_v18, %v354_v23  ;;  %v362_v25 = vmul.f32 %v1220_v19, %v354_v23  ;;  %555 = vmatpush.msra.mxu0 %v354_v23  ;;  %v1728_v19 = vld [vmem:[%s2004_s2 + $0x68] sm:$0xff] }
  0xab   : > { %1102 = vmatmul.msk.f32.gmra.mxu1 %vm327_vm0, %v362_v25  ;;  %1106 = vmatmul.msk.f32.gmra.mxu3 %vm327_vm0, %v359_v24 }
  0xac   : > { %556 = vmatpush.msra.mxu0 %v351_v20  ;;  %v1735_v20 = vld [vmem:[%s2004_s2 + $0x60] sm:$0xff] }
  0xad   : > { %1107 = vmatmul.msk.f32.vlgmr.msra.gmra.mxu0 %vm394_vm1, %v1494_v26 }
  0xae   : > { %812 = vmatpush.msrb.mxu0 %v1644_v60 }
  0xb0   : > { %813 = vmatpush.msrb.mxu0 %v1651_v61 }
  0xb2   : > { %814 = vmatpush.msrb.mxu0 %v1658_v62 }
  0xb4   : > { %815 = vmatpush.msrb.mxu0 %v1665_v63 }
  0xb5   : > { %1108 = vmatmul.msk.f32.gmra.mxu0 %vm394_vm1, %v1503_v27 }
  0xb6   : > { %816 = vmatpush.msrb.mxu0 %v1672_v1 }
  0xb8   : > { %817 = vmatpush.msrb.mxu0 %v1679_v2 }
  0xba   : > { %818 = vmatpush.msrb.mxu0 %v1686_v5 }
  0xbc   : > { %819 = vmatpush.msrb.mxu0 %v1693_v7 }
  0xbd   : > { %1109 = vmatmul.msk.f32.gmra.mxu0 %vm394_vm1, %v1510_v28 }
  0xbe   : > { %820 = vmatpush.msrb.mxu0 %v1700_v11 }
  0xc0   : > { %821 = vmatpush.msrb.mxu0 %v1707_v13 }
  0xc2   : > { %822 = vmatpush.msrb.mxu0 %v1714_v14 }
  0xc4   : > { %823 = vmatpush.msrb.mxu0 %v1721_v15 }
  0xc5   : > { %1110 = vmatmul.msk.f32.gmra.mxu0 %vm394_vm1, %v1517_v29 }
  0xc6   : > { %824 = vmatpush.msrb.mxu0 %v1728_v19 }
  0xc8   : > { %825 = vmatpush.msrb.mxu0 %v1735_v20 }
  0xca   : > { %826 = vmatpush.msrb.mxu0 %v1742_v21 }
  0xcc   : > { %827 = vmatpush.msrb.mxu0 %v1749_v22 }
  0xcd   : > { %1111 = vmatmul.msk.f32.gmra.mxu0 %vm394_vm1, %v1524_v30 }
  0xd5   : > { %1112 = vmatmul.msk.f32.gmra.mxu0 %vm394_vm1, %v1531_v31 }
  0xdd   : > { %1113 = vmatmul.msk.f32.gmra.mxu0 %vm394_vm1, %v1538_v32 }
  0xe5   : > { %1114 = vmatmul.msk.f32.gmra.mxu0 %vm394_vm1, %v1545_v33 }
  0xed   : > { %1115 = vmatmul.msk.f32.gmra.mxu0 %vm394_vm1, %v1552_v34 }
  0xf5   : > { %1116 = vmatmul.msk.f32.gmra.mxu0 %vm394_vm1, %v1559_v35 }
  0xfd   : > { %1117 = vmatmul.msk.f32.gmra.mxu0 %vm394_vm1, %v1566_v36 }
 0x105   : > { %1118 = vmatmul.msk.f32.gmra.mxu0 %vm394_vm1, %v1573_v37 }
 0x10d   : > { %1119 = vmatmul.msk.f32.gmra.mxu0 %vm394_vm1, %v1580_v38 }
 0x115   : > { %1120 = vmatmul.msk.f32.gmra.mxu0 %vm394_vm1, %v1587_v39 }
 0x11d   : > { %1121 = vmatmul.msk.f32.gmra.mxu0 %vm394_vm1, %v1594_v40 }
 0x120   : > { %v386_v41 = vpop.f32.mrf.mxu1 }
 0x121   : > { %v392_v48 = vmul.f32 %v386_v41, %v1613_v44 }
 0x125   : > { %1122 = vmatmul.msk.f32.gmra.mxu0 %vm394_vm1, %v1601_v42 }
 0x128   : > { %v389_v45 = vpop.f32.mrf.mxu1 }
 0x129   : > { %v393_v46 = vmul.f32 %v389_v45, %v1608_v43 }
 0x12a   : > { %v1616_v47 = vpop.f32.mrf.mxu0 }
 0x12b   : > { %412 = vmatpush.msra.mxu2 %v393_v46 }
 0x12d   : > { %413 = vmatpush.msra.mxu2 %v392_v48 }
 0x12e   : > { %1103 = vmatmul.msk.f32.vlgmr.msra.gmra.mxu2 %vm394_vm1, %v2009_v49 }
 0x12f   : > { %470 = vmatpush.msrb.mxu2 %v1644_v60 }
 0x131   : > { %471 = vmatpush.msrb.mxu2 %v1651_v61 }
 0x132   : > { %v1621_v50 = vpop.f32.mrf.mxu0 }
 0x133   : > { %472 = vmatpush.msrb.mxu2 %v1658_v62 }
 0x135   : > { %473 = vmatpush.msrb.mxu2 %v1665_v63 }
 0x136   : > { %1104 = vmatmul.msk.f32.gmra.mxu2 %vm394_vm1, %v2009_v49 }
 0x137   : > { %474 = vmatpush.msrb.mxu2 %v1672_v1 }
 0x139   : > { %475 = vmatpush.msrb.mxu2 %v1679_v2 }
 0x13a   : > { %v1625_v51 = vpop.f32.mrf.mxu0 }
 0x13b   : > { %476 = vmatpush.msrb.mxu2 %v1686_v5 }
 0x13d   : > { %477 = vmatpush.msrb.mxu2 %v1693_v7 }
 0x13f   : > { %478 = vmatpush.msrb.mxu2 %v1700_v11 }
 0x141   : > { %479 = vmatpush.msrb.mxu2 %v1707_v13 }
 0x142   : > { %v1627_v52 = vpop.f32.mrf.mxu0 }
 0x143   : > { %480 = vmatpush.msrb.mxu2 %v1714_v14 }
 0x145   : > { %481 = vmatpush.msrb.mxu2 %v1721_v15 }
 0x147   : > { %482 = vmatpush.msrb.mxu2 %v1728_v19 }
 0x149   : > { %483 = vmatpush.msrb.mxu2 %v1735_v20 }
 0x14a   : > { %v1629_v53 = vpop.f32.mrf.mxu0 }
 0x14b   : > { %484 = vmatpush.msrb.mxu2 %v1742_v21 }
 0x14d   : > { %485 = vmatpush.msrb.mxu2 %v1749_v22 }
 0x152   : > { %v1631_v54 = vpop.f32.mrf.mxu0 }
 0x15a   : > { %v1633_v55 = vpop.f32.mrf.mxu0 }
 0x162   : > { %v1635_v56 = vpop.f32.mrf.mxu0 }
 0x16a   : > { %v1637_v57 = vpop.f32.mrf.mxu0 }
 0x172   : > { %v1639_v58 = vpop.f32.mrf.mxu0 }
 0x173   : > { %v615_v42 = vmul.f32 %v1639_v58, %v1686_v5  ;;  %v612_v58 = vmul.f32 %v1633_v55, %v1707_v13  ;;  %v609_v55 = vmul.f32 %v1627_v52, %v1728_v19 }
 0x17a   : > { %v588_v59 = vpop.f32.mrf.mxu0 }
 0x17b   : > { %v616_v49 = vmul.f32 %v588_v59, %v1679_v2 }
 0x182   : > { %v591_v0 = vpop.f32.mrf.mxu0 }
 0x183   : > { %v617_v48 = vmul.f32 %v591_v0, %v1672_v1 }
 0x18a   : > { %v594_v9 = vpop.f32.mrf.mxu0 }
 0x18b   : > { %v618_v46 = vmul.f32 %v594_v9, %v1665_v63 }
 0x192   : > { %v597_v18 = vpop.f32.mrf.mxu0 }
 0x193   : > { %v619_v45 = vmul.f32 %v597_v18, %v1658_v62  ;;  %v613_v18 = vmul.f32 %v1635_v56, %v1700_v11  ;;  %v610_v56 = vmul.f32 %v1629_v53, %v1721_v15 }
 0x19a   : > { %v600_v23 = vpop.f32.mrf.mxu0 }
 0x19b   : > { %v620_v25 = vmul.f32 %v600_v23, %v1651_v61  ;;  %v444_v23 = vpop.f32.mrf.mxu3 }
 0x1a2   : > { %v603_v24 = vpop.f32.mrf.mxu0 }
 0x1a3   : > { %v621_v41 = vmul.f32 %v603_v24, %v1644_v60  ;;  %v614_v24 = vmul.f32 %v1637_v57, %v1693_v7 }
 0x1a5   : > { %622 = vmatpush.msra.mxu1 %v621_v41  ;;  %v447_v41 = vpop.f32.mrf.mxu3 }
 0x1a7   : > { %623 = vmatpush.msra.mxu1 %v620_v25  ;;  %v1772_v25 = vld [vmem:[%s268_s14] sm:$0xff] }
 0x1a9   : > { %624 = vmatpush.msra.mxu1 %v619_v45 }
 0x1ab   : > { %625 = vmatpush.msra.mxu1 %v618_v46 }
 0x1ad   : > { %626 = vmatpush.msra.mxu1 %v617_v48  ;;  %v608_v48 = vmul.f32 %v1625_v51, %v1735_v20 }
 0x1af   : > { %627 = vmatpush.msra.mxu1 %v616_v49  ;;  %v611_v49 = vmul.f32 %v1631_v54, %v1714_v14 }
 0x1b1   : > { %628 = vmatpush.msra.mxu1 %v615_v42  ;;  %v415_v9 = vpop.f32.mrf.mxu2 }
 0x1b2   : > { %v445_v59 = vadd.f32 %v444_v23, %v415_v9  ;;  %v1783_v23 = vld [vmem:[%s268_s14 + $0x8] sm:$0xff]  ;;  %s257_s14 = sand.u32 1, %s1297_s22  }
 0x1b3   : > { %629 = vmatpush.msra.mxu1 %v614_v24  ;;  %v607_v24 = vmul.f32 %v1621_v50, %v1742_v21  ;;  %s258_s19 = scalar_lea.vmem [#allocation2], %s257_s14  ;;  %s1012_s28 = scalar_lea.sflag [#allocation3], %s257_s14 }
 0x1b4   : > { %v452_v0 = vmul.f32 0.2, %v445_v59  ;;  %vm450_vm2 = vcmp.ge.f32.partialorder %v445_v59, 0.0  ;;  %s1022_s20 = sshll.u32 %s258_s19, 4  ;;  %s1023_s20 = int_to_ptr.vmem [resolvable:$true] %s1022_s20 }
 0x1b5   : > { %630 = vmatpush.msra.mxu1 %v613_v18  ;;  %v606_v18 = vmul.f32 %v1616_v47, %v1749_v22 }
 0x1b6   : > { %v454_v42 = vsel %vm450_vm2, %v445_v59, %v452_v0 }
 0x1b7   : > { %631 = vmatpush.msra.mxu1 %v612_v58  ;;  %v456_v57 = vadd.f32 %v454_v42, %v1772_v25 }
 0x1b9   : > { %632 = vmatpush.msra.mxu1 %v611_v49  ;;  %458 = vmax.xlane.f32.xlu0 %v456_v57  ;;  %v418_v45 = vpop.f32.mrf.mxu2 }
 0x1ba   : > { %v448_v46 = vadd.f32 %v447_v41, %v418_v45  ;;  %v1130_v41 = vld [vmem:[%s2006_s4 + $0x78] sm:$0xff]  ;;  %v1127_v45 = vld [vmem:[%s2006_s4 + $0x60] sm:$0xff] }
 0x1bb   : > { %633 = vmatpush.msra.mxu1 %v610_v56  ;;  %688 = vmatpush.msrb.mxu3 %v1130_v41 }
 0x1bc   : > { %v453_v54 = vmul.f32 0.2, %v448_v46  ;;  %vm451_vm3 = vcmp.ge.f32.partialorder %v448_v46, 0.0 }
 0x1bd   : > { %634 = vmatpush.msra.mxu1 %v609_v55  ;;  %v1128_v55 = vld [vmem:[%s2006_s4 + $0x68] sm:$0xff] }
 0x1be   : > { %v455_v53 = vsel %vm451_vm3, %v448_v46, %v453_v54  ;;  %v1126_v46 = vld [vmem:[%s2006_s4 + $0x58] sm:$0xff]  ;;  %v1124_v54 = vld [vmem:[%s2006_s4 + $0x48] sm:$0xff] }
 0x1bf   : > { %635 = vmatpush.msra.mxu1 %v608_v48  ;;  %v457_v52 = vadd.f32 %v455_v53, %v1783_v23  ;;  %v1125_v48 = vld [vmem:[%s2006_s4 + $0x50] sm:$0xff]  ;;  %v1123_v53 = vld [vmem:[%s2006_s4 + $0x40] sm:$0xff] }
 0x1c1   : > { %636 = vmatpush.msra.mxu1 %v607_v24  ;;  %460 = vmax.xlane.f32.xlu0 %v457_v52 }
 0x1c3   : > { %637 = vmatpush.msra.mxu1 %v606_v18 }
 0x1c5   : > { %777 = vmatpush.msrb.mxu1 %v1407_v3 }
 0x1c7   : > { %778 = vmatpush.msrb.mxu1 %v1413_v4 }
 0x1c9   : > { %779 = vmatpush.msrb.mxu1 %v1421_v6 }
 0x1cb   : > { %780 = vmatpush.msrb.mxu1 %v1431_v8 }
 0x1cd   : > { %781 = vmatpush.msrb.mxu1 %v1440_v10 }
 0x1cf   : > { %782 = vmatpush.msrb.mxu1 %v1454_v12 }
 0x1d1   : > { %783 = vmatpush.msrb.mxu1 %v1472_v16 }
 0x1d3   : > { %784 = vmatpush.msrb.mxu1 %v1479_v17 }
 0x22c   : > { %v459_v47 = vpop.xlane.xlu0 %458 }
 0x22d   : > { %v462_v50 = vmax.f32 %v459_v47, 0.0 }
 0x22f   : > { %v464_v51 = vsub.f32 %v456_v57, %v462_v50  ;;  %v1129_v57 = vld [vmem:[%s2006_s4 + $0x70] sm:$0xff] }
 0x230   : > { %689 = vmatpush.msrb.mxu3 %v1129_v57 }
 0x231   : > { %v466_v9 = vmul.f32 1.442695, %v464_v51 }
 0x232   : > { %690 = vmatpush.msrb.mxu3 %v1128_v55 }
 0x233   : > { %1227 = vpow2.f32 %v466_v9 }
 0x234   : > { %v461_v59 = vpop.xlane.xlu0 %460  ;;  %691 = vmatpush.msrb.mxu3 %v1127_v45 }
 0x235   : > { %v463_v58 = vmax.f32 %v461_v59, 0.0 }
 0x236   : > { %692 = vmatpush.msrb.mxu3 %v1126_v46 }
 0x237   : > { %v465_v0 = vsub.f32 %v457_v52, %v463_v58 }
 0x238   : > { %693 = vmatpush.msrb.mxu3 %v1125_v48 }
 0x239   : > { %v1228_v49 = vpop.eup %1227  ;;  %v468_v42 = vmul.f32 1.442695, %v465_v0 }
 0x23a   : > { %486 = vmatmul.f32.vlgmr.msrb.gmra.mxu2 %v1228_v49  ;;  %638 = vmatmul.f32.vlgmr.msra.gmra.mxu1 %v1228_v49  ;;  %v1223_v49 = vld [vmem:[%s2005_s3 + $0x5] ss:$0 sm:$0xff] }
 0x23b   : > { %1229 = vpow2.f32 %v468_v42  ;;  %694 = vmatpush.msrb.mxu3 %v1124_v54  ;;  %v1224_v42 = vld [vmem:[%s2005_s3 + $0x4] ss:$0 sm:$0xff] }
 0x23d   : > { %695 = vmatpush.msrb.mxu3 %v1123_v53 }
 0x23f   : > { %723 = vmatpush.msra.mxu3 %v1407_v3 }
 0x241   : > { %v1230_v56 = vpop.eup %1229  ;;  %724 = vmatpush.msra.mxu3 %v1413_v4  ;;  %v1221_v4 = vld [vmem:[%s2005_s3 + $0x2] ss:$0 sm:$0xff] }
 0x242   : > { %489 = vmatmul.f32.gmra.mxu2 %v1230_v56  ;;  %641 = vmatmul.f32.gmra.mxu1 %v1230_v56 }
 0x243   : > { %725 = vmatpush.msra.mxu3 %v1421_v6 }
 0x245   : > { %726 = vmatpush.msra.mxu3 %v1431_v8 }
 0x247   : > { %727 = vmatpush.msra.mxu3 %v1440_v10 }
 0x249   : > { %728 = vmatpush.msra.mxu3 %v1454_v12  ;;  %v1222_v12 = vld [vmem:[%s2005_s3 + $0x3] ss:$0 sm:$0xff] }
 0x24b   : > { %729 = vmatpush.msra.mxu3 %v1472_v16 }
 0x24d   : > { %730 = vmatpush.msra.mxu3 %v1479_v17 }
 0x2b7   : > { %v639_v18 = vpop.f32.mrf.mxu1 }
 0x2bd   : > { %v487_v24 = vpop.f32.mrf.mxu2 }
 0x2be   : > { %vm645_vm4 = vcmp.gt.f32.partialorder %v487_v24, 0.0 }
 0x2bf   : > { %v647_v52 = vsel %vm645_vm4, %v487_v24, 1.0  ;;  %v642_v51 = vpop.f32.mrf.mxu1 }
 0x2c0   : > { %1231 = vrcp.f32 %v647_v52  ;;  %v2015_v52 = vmov 1.0  }
 0x2c5   : > { %v490_v3 = vpop.f32.mrf.mxu2 }
 0x2c6   : > { %v1232_v6 = vpop.eup %1231  ;;  %vm646_vm5 = vcmp.gt.f32.partialorder %v490_v3, 0.0 }
 0x2c7   : > { %v651_v8 = vmul.f32 %v1232_v6, %v639_v18  ;;  %v648_v10 = vsel %vm646_vm5, %v490_v3, 1.0 }
 0x2c8   : > { %1233 = vrcp.f32 %v648_v10 }
 0x2c9   : > { %v654_v16 = vmul.f32 %v1221_v4, %v651_v8 }
 0x2cb   : > { %v1836_v47 = vadd.f32 %v1222_v12, %v654_v16 }
 0x2cd   : > { %v659_v17 = vmax.f32 %v1836_v47, 0.0 }
 0x2ce   : > { %v1234_v50 = vpop.eup %1233 }
 0x2cf   : > { %1131 = vmatmul.msk.f32.vlgmr.msrb.gmra.mxu3 %vm327_vm0, %v659_v17  ;;  %v652_v9 = vmul.f32 %v1234_v50, %v642_v51 }
 0x2d0   : > { %1161 = vmatpush.msrb.mxu3 %v1644_v60 }
 0x2d1   : > { %v655_v59 = vmul.f32 %v1221_v4, %v652_v9 }
 0x2d2   : > { %1162 = vmatpush.msrb.mxu3 %v1651_v61 }
 0x2d3   : > { %v1844_v58 = vadd.f32 %v1222_v12, %v655_v59 }
 0x2d4   : > { %1163 = vmatpush.msrb.mxu3 %v1658_v62 }
 0x2d5   : > { %v660_v0 = vmax.f32 %v1844_v58, 0.0  ;;  %v985_v58 = vld [vmem:[%s2005_s3 + $0x8] sm:$0x1] }
 0x2d6   : > { %1164 = vmatpush.msrb.mxu3 %v1665_v63 }
 0x2d7   : > { %1132 = vmatmul.msk.f32.gmra.mxu3 %vm327_vm0, %v660_v0 }
 0x2d8   : > { %1165 = vmatpush.msrb.mxu3 %v1672_v1 }
 0x2da   : > { %1166 = vmatpush.msrb.mxu3 %v1679_v2 }
 0x2dc   : > { %1167 = vmatpush.msrb.mxu3 %v1686_v5 }
 0x2de   : > { %1168 = vmatpush.msrb.mxu3 %v1693_v7 }
 0x2e0   : > { %1169 = vmatpush.msrb.mxu3 %v1700_v11 }
 0x2e2   : > { %1170 = vmatpush.msrb.mxu3 %v1707_v13 }
 0x2e4   : > { %1171 = vmatpush.msrb.mxu3 %v1714_v14 }
 0x2e6   : > { %1172 = vmatpush.msrb.mxu3 %v1721_v15 }
 0x2e8   : > { %1173 = vmatpush.msrb.mxu3 %v1728_v19 }
 0x2ea   : > { %1174 = vmatpush.msrb.mxu3 %v1735_v20 }
 0x2ec   : > { %1175 = vmatpush.msrb.mxu3 %v1742_v21 }
 0x2ee   : > { %1176 = vmatpush.msrb.mxu3 %v1749_v22 }
 0x352   : > { %v697_v56 = vpop.f32.mrf.mxu3 }
 0x353   : > { %v704_v41 = vmul.f32 %v1223_v49, %v697_v56  ;;  %v707_v57 = vmul.f32 %v1224_v42, %v697_v56 }
 0x355   : > { %1133 = vmatmul.msk.f32.vlgmr.msra.gmra.mxu3 %vm327_vm0, %v707_v57  ;;  %1137 = vmatmul.msk.f32.vlgmr.msrb.gmra.mxu1 %vm327_vm0, %v704_v41 }
 0x35a   : > { %v700_v55 = vpop.f32.mrf.mxu3 }
 0x35b   : > { %1177 = vmatpush.msra.mxu3 %v700_v55  ;;  %v708_v45 = vmul.f32 %v1224_v42, %v700_v55  ;;  %v705_v46 = vmul.f32 %v1223_v49, %v700_v55 }
 0x35d   : > { %1134 = vmatmul.msk.f32.gmra.mxu3 %vm327_vm0, %v708_v45  ;;  %1138 = vmatmul.msk.f32.gmra.mxu1 %vm327_vm0, %v705_v46 }
 0x35e   : > { %1178 = vmatpush.msra.mxu3 %v697_v56 }
 0x3d8   : > { %v732_v48 = vpop.f32.mrf.mxu3 }
 0x3d9   : > { %v738_v24 = vmul.f32 %v732_v48, %v1613_v44 }
 0x3e0   : > { %v735_v54 = vpop.f32.mrf.mxu3 }
 0x3e1   : > { %v739_v53 = vmul.f32 %v735_v54, %v1608_v43 }
 0x3e3   : > { %754 = vmatpush.msra.mxu2 %v739_v53 }
 0x3e5   : > { %755 = vmatpush.msra.mxu2 %v738_v24 }
 0x3e6   : > { %1135 = vmatmul.msk.f32.vlgmr.msra.gmra.mxu2 %vm394_vm1, %v2015_v52 }
 0x3e7   : > { %849 = vmatpush.msrb.mxu2 %v700_v55 }
 0x3e9   : > { %850 = vmatpush.msrb.mxu2 %v697_v56 }
 0x3ee   : > { %1136 = vmatmul.msk.f32.gmra.mxu2 %vm394_vm1, %v2015_v52 }
 0x3f6   : > { %1139 = vmatmul.msk.f32.vlgmr.msrb.gmra.mxu2 %vm394_vm1, %v1494_v26  ;;  %v786_v26 = vpop.f32.mrf.mxu1 }
 0x3fe   : > { %1140 = vmatmul.msk.f32.gmra.mxu2 %vm394_vm1, %v1503_v27 }
 0x406   : > { %1141 = vmatmul.msk.f32.gmra.mxu2 %vm394_vm1, %v1510_v28  ;;  %v789_v28 = vpop.f32.mrf.mxu1 }
 0x40e   : > { %1142 = vmatmul.msk.f32.gmra.mxu2 %vm394_vm1, %v1517_v29 }
 0x416   : > { %1143 = vmatmul.msk.f32.gmra.mxu2 %vm394_vm1, %v1524_v30 }
 0x41e   : > { %1144 = vmatmul.msk.f32.gmra.mxu2 %vm394_vm1, %v1531_v31 }
 0x426   : > { %1145 = vmatmul.msk.f32.gmra.mxu2 %vm394_vm1, %v1538_v32 }
 0x42e   : > { %1146 = vmatmul.msk.f32.gmra.mxu2 %vm394_vm1, %v1545_v33 }
 0x436   : > { %1147 = vmatmul.msk.f32.gmra.mxu2 %vm394_vm1, %v1552_v34 }
 0x43e   : > { %1148 = vmatmul.msk.f32.gmra.mxu2 %vm394_vm1, %v1559_v35 }
 0x469   : > { %v757_v27 = vpop.f32.mrf.mxu2 }
 0x46a   : > { %v787_v43 = vadd.f32 %v786_v26, %v757_v27 }
 0x46c   : > { %v794_v18 = vmul.f32 0.2, %v787_v43  ;;  %vm792_vm7 = vcmp.ge.f32.partialorder %v787_v43, 0.0 }
 0x46e   : > { %v796_v33 = vsel %vm792_vm7, %v787_v43, %v794_v18  ;;  %v977_v18 = vld [vmem:[%s2007_s5] sm:$0xff] }
 0x46f   : > { %v798_v34 = vadd.f32 %v796_v33, %v1772_v25  ;;  %v2016_v25 = vld [vmem:[#allocation5_spill] sm:$0xff] }
 0x471   : > { %v760_v29 = vpop.f32.mrf.mxu2 }
 0x472   : > { %v790_v30 = vadd.f32 %v789_v28, %v760_v29 }
 0x474   : > { %v795_v44 = vmul.f32 0.2, %v790_v30  ;;  %vm793_vm6 = vcmp.ge.f32.partialorder %v790_v30, 0.0 }
 0x476   : > { %v797_v31 = vsel %vm793_vm6, %v790_v30, %v795_v44  ;;  %v979_v30 = vld [vmem:[%s2007_s5 + $0x10] sm:$0xff] }
 0x477   : > { %v799_v32 = vadd.f32 %v797_v31, %v1783_v23  ;;  %v978_v31 = vld [vmem:[%s2007_s5 + $0x8] sm:$0xff] }
 0x479   : > { %802 = vmax.xlane.f32.xlu1 %v799_v32  ;;  %v852_v51 = vpop.f32.mrf.mxu2 }
 0x481   : > { %800 = vmax.xlane.f32.xlu1 %v798_v34  ;;  %v855_v9 = vpop.f32.mrf.mxu2 }
 0x489   : > { %v858_v59 = vpop.f32.mrf.mxu2 }
 0x491   : > { %v861_v49 = vpop.f32.mrf.mxu2 }
 0x499   : > { %v864_v42 = vpop.f32.mrf.mxu2 }
 0x4a1   : > { %v867_v41 = vpop.f32.mrf.mxu2 }
 0x4ec   : > { %v803_v3 = vpop.xlane.xlu1 %802 }
 0x4ed   : > { %v805_v35 = vmax.f32 %v803_v3, 0.0 }
 0x4ef   : > { %v807_v4 = vsub.f32 %v799_v32, %v805_v35  ;;  %v1226_v35 = vld [vmem:[%s2005_s3 + $0x7] ss:$0 sm:$0xff] }
 0x4f1   : > { %v810_v6 = vmul.f32 1.442695, %v807_v4 }
 0x4f3   : > { %1235 = vpow2.f32 %v810_v6 }
 0x4f4   : > { %v801_v8 = vpop.xlane.xlu1 %800 }
 0x4f5   : > { %v804_v10 = vmax.f32 %v801_v8, 0.0 }
 0x4f7   : > { %v806_v12 = vsub.f32 %v798_v34, %v804_v10  ;;  %v1225_v34 = vld [vmem:[%s2005_s3 + $0x6] ss:$0 sm:$0xff] }
 0x4f9   : > { %v1236_v16 = vpop.eup %1235  ;;  %v808_v50 = vmul.f32 1.442695, %v806_v12 }
 0x4fa   : > { %831 = vmatmul.f32.vlgmr.msrb.gmra.mxu3 %v1236_v16 }
 0x4fb   : > { %1237 = vpow2.f32 %v808_v50 }
 0x501   : > { %v1238_v23 = vpop.eup %1237 }
 0x502   : > { %828 = vmatmul.f32.vlgmr.msrb.gmra.mxu0 %v1238_v23  ;;  %1149 = vmatmul.msk.f32.vlgmr.msra.gmra.mxu3 %vm394_vm1, %v1566_v36 }
 0x50a   : > { %1150 = vmatmul.msk.f32.gmra.mxu3 %vm394_vm1, %v1573_v37 }
 0x512   : > { %1151 = vmatmul.msk.f32.gmra.mxu3 %vm394_vm1, %v1580_v38  ;;  %v870_v38 = vpop.f32.mrf.mxu2 }
 0x51a   : > { %1152 = vmatmul.msk.f32.gmra.mxu3 %vm394_vm1, %v1587_v39  ;;  %v873_v45 = vpop.f32.mrf.mxu2 }
 0x522   : > { %1153 = vmatmul.msk.f32.gmra.mxu3 %vm394_vm1, %v1594_v40  ;;  %v876_v46 = vpop.f32.mrf.mxu2 }
 0x52a   : > { %1154 = vmatmul.msk.f32.gmra.mxu3 %vm394_vm1, %v2016_v25  ;;  %v879_v26 = vpop.f32.mrf.mxu2 }
 0x52b   : > { %v909_v29 = vmul.f32 %v879_v26, %v1686_v5  ;;  %v902_v5 = vmul.f32 %v858_v59, %v1735_v20 }
 0x57d   : > { %v832_v36 = vpop.f32.mrf.mxu3 }
 0x57e   : > { %vm940_vm9 = vcmp.gt.f32.partialorder %v832_v36, 0.0 }
 0x57f   : > { %v942_v43 = vsel %vm940_vm9, %v832_v36, 1.0 }
 0x585   : > { %v882_v56 = vpop.f32.mrf.mxu3 }
 0x586   : > { %v910_v28 = vmul.f32 %v882_v56, %v1679_v2  ;;  %v903_v2 = vmul.f32 %v861_v49, %v1728_v19  ;;  %v982_v19 = vld [vmem:[%s2007_s5 + $0x28] sm:$0xff] }
 0x58d   : > { %v885_v37 = vpop.f32.mrf.mxu3 }
 0x58e   : > { %v911_v27 = vmul.f32 %v885_v37, %v1672_v1  ;;  %v904_v1 = vmul.f32 %v864_v42, %v1721_v15  ;;  %v983_v15 = vld [vmem:[%s2007_s5 + $0x30] sm:$0xff] }
 0x595   : > { %v888_v57 = vpop.f32.mrf.mxu3 }
 0x596   : > { %v912_v24 = vmul.f32 %v888_v57, %v1665_v63  ;;  %v905_v63 = vmul.f32 %v867_v41, %v1714_v14  ;;  %v984_v14 = vld [vmem:[%s2007_s5 + $0x38] sm:$0xff] }
 0x59d   : > { %v891_v55 = vpop.f32.mrf.mxu3 }
 0x59e   : > { %v913_v53 = vmul.f32 %v891_v55, %v1658_v62  ;;  %v906_v62 = vmul.f32 %v870_v38, %v1707_v13  ;;  %v829_v13 = vpop.f32.mrf.mxu0 }
 0x59f   : > { %vm939_vm8 = vcmp.gt.f32.partialorder %v829_v13, 0.0 }
 0x5a0   : > { %v941_v20 = vsel %vm939_vm8, %v829_v13, 1.0 }
 0x5a1   : > { %1239 = vrcp.f32 %v941_v20 }
 0x5a2   : > { %1241 = vrcp.f32 %v942_v43 }
 0x5a5   : > { %v894_v39 = vpop.f32.mrf.mxu3 }
 0x5a6   : > { %v914_v54 = vmul.f32 %v894_v39, %v1651_v61  ;;  %v907_v61 = vmul.f32 %v873_v45, %v1700_v11  ;;  %v900_v11 = vmul.f32 %v852_v51, %v1749_v22  ;;  %v980_v22 = vld [vmem:[%s2007_s5 + $0x18] sm:$0xff] }
 0x5a7   : > { %v1240_v32 = vpop.eup %1239 }
 0x5a8   : > { %v1242_v4 = vpop.eup %1241 }
 0x5ad   : > { %v897_v48 = vpop.f32.mrf.mxu3 }
 0x5ae   : > { %v915_v40 = vmul.f32 %v897_v48, %v1644_v60  ;;  %v908_v60 = vmul.f32 %v876_v46, %v1693_v7  ;;  %v901_v7 = vmul.f32 %v855_v9, %v1742_v21  ;;  %v981_v21 = vld [vmem:[%s2007_s5 + $0x20] sm:$0xff] }
 0x5b0   : > { %916 = vmatpush.msra.mxu1 %v915_v40 }
 0x5b2   : > { %917 = vmatpush.msra.mxu1 %v914_v54 }
 0x5b4   : > { %918 = vmatpush.msra.mxu1 %v913_v53 }
 0x5b6   : > { %919 = vmatpush.msra.mxu1 %v912_v24 }
 0x5b8   : > { %920 = vmatpush.msra.mxu1 %v911_v27 }
 0x5ba   : > { %921 = vmatpush.msra.mxu1 %v910_v28 }
 0x5bc   : > { %922 = vmatpush.msra.mxu1 %v909_v29 }
 0x5be   : > { %923 = vmatpush.msra.mxu1 %v908_v60 }
 0x5c0   : > { %924 = vmatpush.msra.mxu1 %v907_v61 }
 0x5c2   : > { %925 = vmatpush.msra.mxu1 %v906_v62 }
 0x5c4   : > { %926 = vmatpush.msra.mxu1 %v905_v63 }
 0x5c6   : > { %927 = vmatpush.msra.mxu1 %v904_v1 }
 0x5c8   : > { %928 = vmatpush.msra.mxu1 %v903_v2 }
 0x5ca   : > { %929 = vmatpush.msra.mxu1 %v902_v5 }
 0x5cc   : > { %930 = vmatpush.msra.mxu1 %v901_v7 }
 0x5ce   : > { %931 = vmatpush.msra.mxu1 %v900_v11 }
 0x5cf   : > { %932 = vmatmul.f32.vlgmr.msra.gmra.mxu1 %v1238_v23 }
 0x5d0   : > { %997 = vmatpush.msrb.mxu1 %v984_v14 }
 0x5d2   : > { %998 = vmatpush.msrb.mxu1 %v983_v15 }
 0x5d4   : > { %999 = vmatpush.msrb.mxu1 %v982_v19 }
 0x5d6   : > { %1000 = vmatpush.msrb.mxu1 %v981_v21 }
 0x5d7   : > { %935 = vmatmul.f32.gmra.mxu1 %v1236_v16 }
 0x5d8   : > { %1001 = vmatpush.msrb.mxu1 %v980_v22 }
 0x5da   : > { %1002 = vmatpush.msrb.mxu1 %v979_v30 }
 0x5dc   : > { %1003 = vmatpush.msrb.mxu1 %v978_v31 }
 0x5de   : > { %1004 = vmatpush.msrb.mxu1 %v977_v18 }
 0x64c   : > { %v933_v44 = vpop.f32.mrf.mxu1 }
 0x64d   : > { %v945_v33 = vmul.f32 %v1240_v32, %v933_v44 }
 0x64f   : > { %v948_v3 = vmul.f32 %v1225_v34, %v945_v33 }
 0x651   : > { %v951_v10 = vadd.f32 %v1226_v35, %v948_v3 }
 0x653   : > { %v953_v50 = vmax.f32 %v951_v10, 0.0 }
 0x654   : > { %v936_v6 = vpop.f32.mrf.mxu1 }
 0x655   : > { %v946_v8 = vmul.f32 %v1242_v4, %v936_v6  ;;  %v955_v51 = vadd.f32 %v953_v50, %v659_v17 }
 0x657   : > { %v949_v12 = vmul.f32 %v1225_v34, %v946_v8 }
 0x659   : > { %v952_v16 = vadd.f32 %v1226_v35, %v949_v12 }
 0x65b   : > { %v954_v23 = vmax.f32 %v952_v16, 0.0 }
 0x65d   : > { %v956_v25 = vadd.f32 %v954_v23, %v660_v0 }
 0x65f   : > { %971 = vmatpush.msrb.mxu3 %v956_v25 }
 0x661   : > { %972 = vmatpush.msrb.mxu3 %v955_v51 }
 0x662   : > { %1155 = vmatmul.msk.f32.vlgmr.msrb.gmra.mxu3 %vm394_vm1, %v2015_v52 }
 0x6e5   : > { %v974_v9 = vpop.f32.mrf.mxu3 }
 0x6e6   : > { %1156 = vmatmul.msk.f32.vlgmr.msrb.gmra.mxu1 %vm327_vm0, %v974_v9 }
 0x763   : > { %v1006_v47 = vpop.f32.mrf.mxu1 }
 0x764   : > { %v1007_v17 = vadd.f32 %v1006_v47, %v985_v58 }
 0x766   : > { %1010 = vst.msk [vmem:[%s258_s19] sm:$0x1] %vm1009_vm10, %v1007_v17 }
 0x767   : > { %1270 = shalt.err (!%p1267_p3)
}
 0x768   : > { %1179 = dma.vmem_to_hbm [thread:$0]  (%p1381_p5), %s1023_s20, 16, %s1025_s26, %s1012_s28  }
 0x769 PF: > { %p1185_p4 = scmp.ge.s32.totalorder %s1305_s24, 2  ;;  %s1036_s14 = sand.u32 1, %s1293_s21  }
 0x76a   : > { %s1037_s11 = scalar_lea.sflag [#allocation3], %s1036_s14 }
 0x76b   : > { %p1182_p7 = pnand %p1185_p4, %p1385_p6 }
 0x76d   : > { %p1183_p8 = pneg %p1182_p7 }
 0x76f   : > { %1288 = dma.done.wait (%p1183_p8), %s1037_s11, 16  }
 0x770   : > { %1290 = vsyncadd (%p1183_p8), %s1037_s11, 4294967280  ;;  %p16_p9 = scmp.ge.s32.totalorder %s1368_s27, 6   ;;  %s2017_s21 = smov %s1297_s22 }
 0x771   : > { %s2018_s22 = smov %s1301_s23  ;;  %s2019_s23 = smov %s1379_s30 }
 0x772   : > { %s2020_s24 = smov %s1368_s27  ;;  %18 = sbr.rel (!%p16_p9) target bundleno = 3 (0x3), region = 83 }
 0x777   :  { %1042 = vsyncpa [#allocation3], 1 }
 0x778   :  { %1044 = vsyncpa [#allocation3 + $0x1], 1 }

</bundles_post_ra>
